<compile_context>
chip_gen: v7x
topology: tpu7x:2x2x1
jax: 0.10.0
libtpu: 0.0.40
codegen_flags: <defaults>
</compile_context>

<pallas_src>
import math

import jax
import jax.numpy as jnp
from jax import lax
from jax.experimental import pallas as pl
from jax.experimental.pallas import tpu as pltpu


CFG = dict(vocab=64, type_vocab=2, max_pos=16, hidden=32,
           heads=2, layers=2, intermediate=64, num_labels=2)

_LANE = 128  # lane-dense padded width for the classifier output


# ----------------------------- fused Pallas kernel ------------------------------

def _layernorm(x, g, b, eps=1e-12):
    mu = jnp.mean(x, axis=-1, keepdims=True)
    xc = x - mu
    var = jnp.mean(xc * xc, axis=-1, keepdims=True)
    return xc * lax.rsqrt(var + eps) * g + b


def _electra_kernel(x_emb_ref, bias_ref, eg_ref, eb_ref,
                    qw_ref, qb_ref, kw_ref, kb_ref, vw_ref, vb_ref,
                    ow_ref, ob_ref, ln1g_ref, ln1b_ref,
                    iw_ref, ib_ref, fw_ref, fb_ref,
                    ln2g_ref, ln2b_ref, clsw_ref, clsb_ref,
                    out_ref, x_state):
    """One (batch row, encoder layer) grid step of the fused ELECTRA forward."""
    l = pl.program_id(1)
    L = pl.num_programs(1)
    nH, _, Dh = qw_ref.shape            # (heads, hidden, head_dim)
    S, H = x_state.shape

    # first layer step: embedding LayerNorm (embedding dropout = identity in eval)
    @pl.when(l == 0)
    def _():
        x_state[...] = _layernorm(x_emb_ref[...].astype(jnp.float32),
                                  eg_ref[...], eb_ref[...])

    x = x_state[...]                                               # (S, H) f32 residual stream
    xb = jnp.broadcast_to(x.astype(jnp.bfloat16)[None], (nH, S, H))

    # per-head Q/K/V projections as head-batched MXU matmuls (bf16 in, f32 acc);
    # the 1/sqrt(Dh) scale is folded into the Q weights/bias at prep time.
    dn_proj = (((2,), (1,)), ((0,), (0,)))                         # 'bsh,bhd->bsd'
    q = lax.dot_general(xb, qw_ref[...], dn_proj,
                        preferred_element_type=jnp.float32) + qb_ref[...][:, None, :]
    k = lax.dot_general(xb, kw_ref[...], dn_proj,
                        preferred_element_type=jnp.float32) + kb_ref[...][:, None, :]
    v = lax.dot_general(xb, vw_ref[...], dn_proj,
                        preferred_element_type=jnp.float32) + vb_ref[...][:, None, :]

    # attention, batched over heads (no per-head slicing / concatenation)
    s = lax.dot_general(q.astype(jnp.bfloat16), k.astype(jnp.bfloat16),
                        (((2,), (2,)), ((0,), (0,))),              # 'bqd,bkd->bqk'
                        preferred_element_type=jnp.float32)        # (nH, S, S)
    s = s + bias_ref[...]                                          # (1, S) key-axis mask bias
    s = s - jnp.max(s, axis=-1, keepdims=True)
    p = jnp.exp(s)
    p = p * pl.reciprocal(jnp.sum(p, axis=-1, keepdims=True), approx=True)
    ctx = lax.dot_general(p.astype(jnp.bfloat16), v.astype(jnp.bfloat16),
                          (((2,), (1,)), ((0,), (0,))),            # 'bqk,bkd->bqd'
                          preferred_element_type=jnp.float32)      # (nH, S, Dh)

    # output projection fused with head merge: sum_h ctx[h] @ ow[h]
    attn = lax.dot_general(ctx.astype(jnp.bfloat16), ow_ref[...],
                           (((2,), (1,)), ((0,), (0,))),
                           preferred_element_type=jnp.float32)     # (nH, S, H)
    attn = jnp.sum(attn, axis=0) + ob_ref[...]                     # (S, H)
    x = _layernorm(x + attn, ln1g_ref[...], ln1b_ref[...])         # fused residual + LN

    inter = jnp.dot(x.astype(jnp.bfloat16), iw_ref[...],
                    preferred_element_type=jnp.float32) + ib_ref[...]
    # TODO(synk): HF ELECTRA uses exact erf-GELU; tanh approximation kept for
    # robust Mosaic lowering (small numerical drift vs. the torch reference).
    inter = jax.nn.gelu(inter, approximate=True)
    ffn = jnp.dot(inter.astype(jnp.bfloat16), fw_ref[...],
                  preferred_element_type=jnp.float32) + fb_ref[...]
    x = _layernorm(x + ffn, ln2g_ref[...], ln2b_ref[...])          # fused residual + LN
    x_state[...] = x

    # last layer step: CLS pooling -> dropout(0.3) (eval identity) -> classifier.
    # Classifier output is lane-dense (128 zero-padded lanes); wrapper slices to num_labels.
    @pl.when(l == L - 1)
    def _():
        pooled = x[0:1, :]                                         # CLS token, (1, H)
        out_ref[...] = (jnp.dot(pooled, clsw_ref[...],
                                preferred_element_type=jnp.float32)
                        + clsb_ref[...]).astype(out_ref.dtype)


# ------------------------------ params & one-time prep --------------------------

def init_params(key, cfg):
    H, I = cfg['hidden'], cfg['intermediate']

    def nrm(k, shape):
        return 0.02 * jax.random.normal(k, shape, dtype=jnp.float32)

    keys = iter(jax.random.split(key, 64))
    params = {
        'word_emb': nrm(next(keys), (cfg['vocab'], H)),
        'pos_emb': nrm(next(keys), (cfg['max_pos'], H)),
        'type_emb': nrm(next(keys), (cfg['type_vocab'], H)),
        'emb_ln_g': jnp.ones((H,), jnp.float32),
        'emb_ln_b': jnp.zeros((H,), jnp.float32),
        'cls_w': nrm(next(keys), (H, cfg['num_labels'])),
        'cls_b': jnp.zeros((cfg['num_labels'],), jnp.float32),
        'layers': [],
    }
    for _ in range(cfg['layers']):
        params['layers'].append({
            'q_w': nrm(next(keys), (H, H)), 'q_b': jnp.zeros((H,), jnp.float32),
            'k_w': nrm(next(keys), (H, H)), 'k_b': jnp.zeros((H,), jnp.float32),
            'v_w': nrm(next(keys), (H, H)), 'v_b': jnp.zeros((H,), jnp.float32),
            'o_w': nrm(next(keys), (H, H)), 'o_b': jnp.zeros((H,), jnp.float32),
            'ln1_g': jnp.ones((H,), jnp.float32), 'ln1_b': jnp.zeros((H,), jnp.float32),
            'i_w': nrm(next(keys), (H, I)), 'i_b': jnp.zeros((I,), jnp.float32),
            'f_w': nrm(next(keys), (I, H)), 'f_b': jnp.zeros((H,), jnp.float32),
            'ln2_g': jnp.ones((H,), jnp.float32), 'ln2_b': jnp.zeros((H,), jnp.float32),
        })
    return params


def prepare_params(params, cfg):
    """One-time weight prep: per-head layouts, [L,...] stacking, bf16 cast, padding."""
    H, nH = cfg['hidden'], cfg['heads']
    NL = cfg['num_labels']
    Dh = H // nH
    scale = 1.0 / math.sqrt(Dh)
    layers = params['layers']

    def head_cols(w):  # (H_in, H_out) -> (nH, H_in, Dh): per-head output columns
        return jnp.transpose(w.reshape(H, nH, Dh), (1, 0, 2))

    def stack(fn):
        return jnp.stack([fn(lp) for lp in layers], axis=0)

    return dict(
        word_emb=params['word_emb'], pos_emb=params['pos_emb'],
        type_emb=params['type_emb'],
        emb_ln_g=params['emb_ln_g'][None, :], emb_ln_b=params['emb_ln_b'][None, :],
        qw=stack(lambda lp: head_cols(lp['q_w']) * scale).astype(jnp.bfloat16),
        qb=stack(lambda lp: lp['q_b'].reshape(nH, Dh) * scale),
        kw=stack(lambda lp: head_cols(lp['k_w'])).astype(jnp.bfloat16),
        kb=stack(lambda lp: lp['k_b'].reshape(nH, Dh)),
        vw=stack(lambda lp: head_cols(lp['v_w'])).astype(jnp.bfloat16),
        vb=stack(lambda lp: lp['v_b'].reshape(nH, Dh)),
        ow=stack(lambda lp: lp['o_w'].reshape(nH, Dh, H)).astype(jnp.bfloat16),
        ob=stack(lambda lp: lp['o_b'][None, :]),
        ln1g=stack(lambda lp: lp['ln1_g'][None, :]),
        ln1b=stack(lambda lp: lp['ln1_b'][None, :]),
        iw=stack(lambda lp: lp['i_w']).astype(jnp.bfloat16),
        ib=stack(lambda lp: lp['i_b'][None, :]),
        fw=stack(lambda lp: lp['f_w']).astype(jnp.bfloat16),
        fb=stack(lambda lp: lp['f_b'][None, :]),
        ln2g=stack(lambda lp: lp['ln2_g'][None, :]),
        ln2b=stack(lambda lp: lp['ln2_b'][None, :]),
        cls_w=jnp.pad(params['cls_w'], ((0, 0), (0, _LANE - NL))),        # (H, 128)
        cls_b=jnp.pad(params['cls_b'], (0, _LANE - NL))[None, :],         # (1, 128)
    )


# ------------------------------ forward (jitted glue) ----------------------------

def make_forward(cfg):
    H, I, nH, L = cfg['hidden'], cfg['intermediate'], cfg['heads'], cfg['layers']
    NL = cfg['num_labels']
    Dh = H // nH

    # scoped-VMEM budget: ~2 double-buffered per-layer weight tiles + headroom,
    # clamped for portability (v5e default is 16 MiB; v7x physical VMEM is 64 MiB).
    per_layer_bytes = 2 * (4 * H * H + 2 * H * I) + 4 * (3 * H + 2 * I + 5 * H)
    vmem_limit = int(min(max(2 * per_layer_bytes + (4 << 20), 8 << 20), 48 << 20))

    def per_layer_spec(shape):   # stacked [L, ...] weight: squeeze + stream over l
        rest = tuple(int(d) for d in shape[1:])

        def idx(b, l, _n=len(rest)):
            return (l,) + (0,) * _n

        return pl.BlockSpec((None,) + rest, idx)

    def shared_spec(shape):      # layer-invariant tensor, single resident block
        dims = tuple(int(d) for d in shape)

        def idx(b, l, _n=len(dims)):
            return (0,) * _n

        return pl.BlockSpec(dims, idx)

    @jax.jit
    def forward(prep, input_ids, attention_mask, token_type_ids):
        B, S = input_ids.shape
        pos = jnp.arange(S)
        # data-dependent embedding gathers stay in XLA; everything else is in-kernel
        x = (prep['word_emb'][input_ids]
             + prep['pos_emb'][pos][None, :, :]
             + prep['type_emb'][token_type_ids]).astype(jnp.float32)            # (B, S, H)
        bias = ((1.0 - attention_mask.astype(jnp.float32)) * -1e9)[:, None, :]  # (B, 1, S)

        args = (x, bias, prep['emb_ln_g'], prep['emb_ln_b'],
                prep['qw'], prep['qb'], prep['kw'], prep['kb'],
                prep['vw'], prep['vb'], prep['ow'], prep['ob'],
                prep['ln1g'], prep['ln1b'], prep['iw'], prep['ib'],
                prep['fw'], prep['fb'], prep['ln2g'], prep['ln2b'],
                prep['cls_w'], prep['cls_b'])

        in_specs = [
            pl.BlockSpec((None, S, H), lambda b, l: (b, 0, 0)),    # embeddings (per batch row)
            pl.BlockSpec((None, 1, S), lambda b, l: (b, 0, 0)),    # additive mask bias
            shared_spec(prep['emb_ln_g'].shape), shared_spec(prep['emb_ln_b'].shape),
            per_layer_spec(prep['qw'].shape), per_layer_spec(prep['qb'].shape),
            per_layer_spec(prep['kw'].shape), per_layer_spec(prep['kb'].shape),
            per_layer_spec(prep['vw'].shape), per_layer_spec(prep['vb'].shape),
            per_layer_spec(prep['ow'].shape), per_layer_spec(prep['ob'].shape),
            per_layer_spec(prep['ln1g'].shape), per_layer_spec(prep['ln1b'].shape),
            per_layer_spec(prep['iw'].shape), per_layer_spec(prep['ib'].shape),
            per_layer_spec(prep['fw'].shape), per_layer_spec(prep['fb'].shape),
            per_layer_spec(prep['ln2g'].shape), per_layer_spec(prep['ln2b'].shape),
            shared_spec(prep['cls_w'].shape), shared_spec(prep['cls_b'].shape),
        ]

        flops = (L * B * (8 * S * H * H + 4 * S * H * I + 4 * nH * S * S * Dh)
                 + 2 * B * H * _LANE)
        transcendentals = L * B * (nH * S * S + S * I)
        bytes_accessed = int(sum(a.size * a.dtype.itemsize for a in args)
                             + B * _LANE * 4)

        out = pl.pallas_call(
            _electra_kernel,
            out_shape=jax.ShapeDtypeStruct((B, 1, _LANE), jnp.float32),
            grid=(B, L),
            in_specs=in_specs,
            out_specs=pl.BlockSpec((None, 1, _LANE), lambda b, l: (b, 0, 0)),
            scratch_shapes=[pltpu.VMEM((S, H), jnp.float32)],      # resident residual stream
            compiler_params=pltpu.CompilerParams(
                dimension_semantics=("parallel", "arbitrary"),
                vmem_limit_bytes=vmem_limit),
            cost_estimate=pl.CostEstimate(flops=int(flops),
                                          transcendentals=int(transcendentals),
                                          bytes_accessed=bytes_accessed),
        )(*args)
        return out[:, 0, :NL]

    return forward


# ---------------------------------- main -------------------------------------

if __name__ == "__main__":
    key = jax.random.PRNGKey(0)
    k_param, k_ids = jax.random.split(key)

    B, S = 2, 8
    params = init_params(k_param, CFG)
    prep = prepare_params(params, CFG)          # one-time weight prep (hoisted)
    forward = make_forward(CFG)

    input_ids = jax.random.randint(k_ids, (B, S), 0, CFG['vocab'], dtype=jnp.int32)
    attention_mask = jnp.array([[1, 1, 1, 1, 1, 1, 1, 1],
                                [1, 1, 1, 1, 1, 1, 0, 0]], dtype=jnp.int32)
    token_type_ids = jnp.zeros((B, S), dtype=jnp.int32)

    logits = forward(prep, input_ids, attention_mask, token_type_ids)
    jax.block_until_ready(logits)
    assert logits.shape == (B, CFG['num_labels'])
    print("KERNEL_OK")
</pallas_src>

<mosaic_0001>
module attributes {stable_mosaic.version = 11 : i64} {
  func.func @_electra_kernel(%arg0: i32, %arg1: i32, %arg2: memref<1x8x32xf32, #tpu.memory_space<vmem>>, %arg3: memref<1x1x8xf32, #tpu.memory_space<vmem>>, %arg4: memref<1x32xf32, #tpu.memory_space<vmem>>, %arg5: memref<1x32xf32, #tpu.memory_space<vmem>>, %arg6: memref<1x2x32x16xbf16, #tpu.memory_space<vmem>>, %arg7: memref<1x2x16xf32, #tpu.memory_space<vmem>>, %arg8: memref<1x2x32x16xbf16, #tpu.memory_space<vmem>>, %arg9: memref<1x2x16xf32, #tpu.memory_space<vmem>>, %arg10: memref<1x2x32x16xbf16, #tpu.memory_space<vmem>>, %arg11: memref<1x2x16xf32, #tpu.memory_space<vmem>>, %arg12: memref<1x2x16x32xbf16, #tpu.memory_space<vmem>>, %arg13: memref<1x1x32xf32, #tpu.memory_space<vmem>>, %arg14: memref<1x1x32xf32, #tpu.memory_space<vmem>>, %arg15: memref<1x1x32xf32, #tpu.memory_space<vmem>>, %arg16: memref<1x32x64xbf16, #tpu.memory_space<vmem>>, %arg17: memref<1x1x64xf32, #tpu.memory_space<vmem>>, %arg18: memref<1x64x32xbf16, #tpu.memory_space<vmem>>, %arg19: memref<1x1x32xf32, #tpu.memory_space<vmem>>, %arg20: memref<1x1x32xf32, #tpu.memory_space<vmem>>, %arg21: memref<1x1x32xf32, #tpu.memory_space<vmem>>, %arg22: memref<32x128xf32, #tpu.memory_space<vmem>>, %arg23: memref<1x128xf32, #tpu.memory_space<vmem>>, %arg24: memref<1x1x128xf32, #tpu.memory_space<vmem>>, %arg25: memref<8x32xf32, #tpu.memory_space<vmem>>) attributes {dimension_semantics = [#tpu.dimension_semantics<parallel>, #tpu.dimension_semantics<arbitrary>], iteration_bounds = array<i64: 2, 2>, scalar_prefetch = 0 : i64, scratch_operands = 1 : i64, tpu.core_type = #tpu.core_type<tc>, window_params = [{transform_indices = @transform_0, window_bounds = array<i64: 1, 8, 32>}, {transform_indices = @transform_1, window_bounds = array<i64: 1, 1, 8>}, {pipeline_mode = #tpu.pipeline_mode<synchronous>, transform_indices = @transform_2, window_bounds = array<i64: 1, 32>}, {pipeline_mode = #tpu.pipeline_mode<synchronous>, transform_indices = @transform_3, window_bounds = array<i64: 1, 32>}, {transform_indices = @transform_4, window_bounds = array<i64: 1, 2, 32, 16>}, {transform_indices = @transform_5, window_bounds = array<i64: 1, 2, 16>}, {transform_indices = @transform_6, window_bounds = array<i64: 1, 2, 32, 16>}, {transform_indices = @transform_7, window_bounds = array<i64: 1, 2, 16>}, {transform_indices = @transform_8, window_bounds = array<i64: 1, 2, 32, 16>}, {transform_indices = @transform_9, window_bounds = array<i64: 1, 2, 16>}, {transform_indices = @transform_10, window_bounds = array<i64: 1, 2, 16, 32>}, {transform_indices = @transform_11, window_bounds = array<i64: 1, 1, 32>}, {transform_indices = @transform_12, window_bounds = array<i64: 1, 1, 32>}, {transform_indices = @transform_13, window_bounds = array<i64: 1, 1, 32>}, {transform_indices = @transform_14, window_bounds = array<i64: 1, 32, 64>}, {transform_indices = @transform_15, window_bounds = array<i64: 1, 1, 64>}, {transform_indices = @transform_16, window_bounds = array<i64: 1, 64, 32>}, {transform_indices = @transform_17, window_bounds = array<i64: 1, 1, 32>}, {transform_indices = @transform_18, window_bounds = array<i64: 1, 1, 32>}, {transform_indices = @transform_19, window_bounds = array<i64: 1, 1, 32>}, {pipeline_mode = #tpu.pipeline_mode<synchronous>, transform_indices = @transform_20, window_bounds = array<i64: 32, 128>}, {pipeline_mode = #tpu.pipeline_mode<synchronous>, transform_indices = @transform_21, window_bounds = array<i64: 1, 128>}, {transform_indices = @transform_22, window_bounds = array<i64: 1, 1, 128>}]} {
    %c0_i32 = arith.constant 0 : i32
    %0 = arith.cmpi eq, %arg1, %c0_i32 : i32
    %1 = arith.extui %0 : i1 to i32
    %c0_i32_0 = arith.constant 0 : i32
    %2 = arith.cmpi ne, %1, %c0_i32_0 : i32
    scf.if %2 {
      %c0_84 = arith.constant 0 : index
      %c0_85 = arith.constant 0 : index
      %c0_86 = arith.constant 0 : index
      %145 = vector.load %arg2[%c0_84, %c0_85, %c0_86] : memref<1x8x32xf32, #tpu.memory_space<vmem>>, vector<1x8x32xf32>
      %146 = vector.shape_cast %145 : vector<1x8x32xf32> to vector<8x32xf32>
      %c0_87 = arith.constant 0 : index
      %c0_88 = arith.constant 0 : index
      %147 = vector.load %arg4[%c0_87, %c0_88] : memref<1x32xf32, #tpu.memory_space<vmem>>, vector<1x32xf32>
      %c0_89 = arith.constant 0 : index
      %c0_90 = arith.constant 0 : index
      %148 = vector.load %arg5[%c0_89, %c0_90] : memref<1x32xf32, #tpu.memory_space<vmem>>, vector<1x32xf32>
      %cst_91 = arith.constant dense<0.000000e+00> : vector<8xf32>
      %149 = vector.multi_reduction <add>, %146, %cst_91 [1] : vector<8x32xf32> to vector<8xf32>
      %150 = vector.shape_cast %149 : vector<8xf32> to vector<8x1xf32>
      %cst_92 = arith.constant 3.200000e+01 : f32
      %151 = vector.broadcast %cst_92 : f32 to vector<8x1xf32>
      %152 = arith.divf %150, %151 : vector<8x1xf32>
      %153 = vector.broadcast %152 : vector<8x1xf32> to vector<8x32xf32>
      %154 = arith.subf %146, %153 : vector<8x32xf32>
      %155 = arith.mulf %154, %154 : vector<8x32xf32>
      %cst_93 = arith.constant dense<0.000000e+00> : vector<8xf32>
      %156 = vector.multi_reduction <add>, %155, %cst_93 [1] : vector<8x32xf32> to vector<8xf32>
      %157 = vector.shape_cast %156 : vector<8xf32> to vector<8x1xf32>
      %cst_94 = arith.constant 3.200000e+01 : f32
      %158 = vector.broadcast %cst_94 : f32 to vector<8x1xf32>
      %159 = arith.divf %157, %158 : vector<8x1xf32>
      %cst_95 = arith.constant 9.99999996E-13 : f32
      %160 = vector.broadcast %cst_95 : f32 to vector<8x1xf32>
      %161 = arith.addf %159, %160 : vector<8x1xf32>
      %162 = math.rsqrt %161 : vector<8x1xf32>
      %163 = vector.broadcast %162 : vector<8x1xf32> to vector<8x32xf32>
      %164 = arith.mulf %154, %163 : vector<8x32xf32>
      %165 = vector.broadcast %147 : vector<1x32xf32> to vector<8x32xf32>
      %166 = arith.mulf %164, %165 : vector<8x32xf32>
      %167 = vector.broadcast %148 : vector<1x32xf32> to vector<8x32xf32>
      %168 = arith.addf %166, %167 : vector<8x32xf32>
      %c0_96 = arith.constant 0 : index
      %c0_97 = arith.constant 0 : index
      %169 = vector.load %arg25[%c0_96, %c0_97] : memref<8x32xf32, #tpu.memory_space<vmem>>, vector<8x32xf32>
      tpu.vector_store %arg25[%c0_96, %c0_97], %168 {strides = array<i32>} : memref<8x32xf32, #tpu.memory_space<vmem>>, vector<8x32xf32>,
    } else {
    }
    %c0 = arith.constant 0 : index
    %c0_1 = arith.constant 0 : index
    %3 = vector.load %arg25[%c0, %c0_1] : memref<8x32xf32, #tpu.memory_space<vmem>>, vector<8x32xf32>
    %4 = arith.truncf %3 : vector<8x32xf32> to vector<8x32xbf16>
    %5 = vector.shape_cast %4 : vector<8x32xbf16> to vector<1x8x32xbf16>
    %6 = vector.shape_cast %5 : vector<1x8x32xbf16> to vector<1x8x32xbf16>
    %7 = vector.broadcast %6 : vector<1x8x32xbf16> to vector<2x8x32xbf16>
    %c0_2 = arith.constant 0 : index
    %c0_3 = arith.constant 0 : index
    %c0_4 = arith.constant 0 : index
    %c0_5 = arith.constant 0 : index
    %8 = vector.load %arg6[%c0_2, %c0_3, %c0_4, %c0_5] : memref<1x2x32x16xbf16, #tpu.memory_space<vmem>>, vector<1x2x32x16xbf16>
    %9 = vector.shape_cast %8 : vector<1x2x32x16xbf16> to vector<2x32x16xbf16>
    %cst = arith.constant dense<0.000000e+00> : vector<2x8x16xf32>
    %10 = tpu.matmul %7, %9, %cst {dimension_numbers = #tpu.dot_dimension_numbers<[2], [1], [1], [2], [0, 0, 0, 1, 1, 2], [0], [0]>} : vector<2x8x32xbf16>, vector<2x32x16xbf16>, vector<2x8x16xf32> -> vector<2x8x16xf32>
    %c0_6 = arith.constant 0 : index
    %c0_7 = arith.constant 0 : index
    %c0_8 = arith.constant 0 : index
    %11 = vector.load %arg7[%c0_6, %c0_7, %c0_8] : memref<1x2x16xf32, #tpu.memory_space<vmem>>, vector<1x2x16xf32>
    %12 = vector.shape_cast %11 : vector<1x2x16xf32> to vector<2x16xf32>
    %13 = vector.shape_cast %12 : vector<2x16xf32> to vector<2x1x16xf32>
    %14 = vector.broadcast %13 : vector<2x1x16xf32> to vector<2x8x16xf32>
    %15 = arith.addf %10, %14 : vector<2x8x16xf32>
    %c0_9 = arith.constant 0 : index
    %c0_10 = arith.constant 0 : index
    %c0_11 = arith.constant 0 : index
    %c0_12 = arith.constant 0 : index
    %16 = vector.load %arg8[%c0_9, %c0_10, %c0_11, %c0_12] : memref<1x2x32x16xbf16, #tpu.memory_space<vmem>>, vector<1x2x32x16xbf16>
    %17 = vector.shape_cast %16 : vector<1x2x32x16xbf16> to vector<2x32x16xbf16>
    %cst_13 = arith.constant dense<0.000000e+00> : vector<2x8x16xf32>
    %18 = tpu.matmul %7, %17, %cst_13 {dimension_numbers = #tpu.dot_dimension_numbers<[2], [1], [1], [2], [0, 0, 0, 1, 1, 2], [0], [0]>} : vector<2x8x32xbf16>, vector<2x32x16xbf16>, vector<2x8x16xf32> -> vector<2x8x16xf32>
    %c0_14 = arith.constant 0 : index
    %c0_15 = arith.constant 0 : index
    %c0_16 = arith.constant 0 : index
    %19 = vector.load %arg9[%c0_14, %c0_15, %c0_16] : memref<1x2x16xf32, #tpu.memory_space<vmem>>, vector<1x2x16xf32>
    %20 = vector.shape_cast %19 : vector<1x2x16xf32> to vector<2x16xf32>
    %21 = vector.shape_cast %20 : vector<2x16xf32> to vector<2x1x16xf32>
    %22 = vector.broadcast %21 : vector<2x1x16xf32> to vector<2x8x16xf32>
    %23 = arith.addf %18, %22 : vector<2x8x16xf32>
    %c0_17 = arith.constant 0 : index
    %c0_18 = arith.constant 0 : index
    %c0_19 = arith.constant 0 : index
    %c0_20 = arith.constant 0 : index
    %24 = vector.load %arg10[%c0_17, %c0_18, %c0_19, %c0_20] : memref<1x2x32x16xbf16, #tpu.memory_space<vmem>>, vector<1x2x32x16xbf16>
    %25 = vector.shape_cast %24 : vector<1x2x32x16xbf16> to vector<2x32x16xbf16>
    %cst_21 = arith.constant dense<0.000000e+00> : vector<2x8x16xf32>
    %26 = tpu.matmul %7, %25, %cst_21 {dimension_numbers = #tpu.dot_dimension_numbers<[2], [1], [1], [2], [0, 0, 0, 1, 1, 2], [0], [0]>} : vector<2x8x32xbf16>, vector<2x32x16xbf16>, vector<2x8x16xf32> -> vector<2x8x16xf32>
    %c0_22 = arith.constant 0 : index
    %c0_23 = arith.constant 0 : index
    %c0_24 = arith.constant 0 : index
    %27 = vector.load %arg11[%c0_22, %c0_23, %c0_24] : memref<1x2x16xf32, #tpu.memory_space<vmem>>, vector<1x2x16xf32>
    %28 = vector.shape_cast %27 : vector<1x2x16xf32> to vector<2x16xf32>
    %29 = vector.shape_cast %28 : vector<2x16xf32> to vector<2x1x16xf32>
    %30 = vector.broadcast %29 : vector<2x1x16xf32> to vector<2x8x16xf32>
    %31 = arith.addf %26, %30 : vector<2x8x16xf32>
    %32 = arith.truncf %15 : vector<2x8x16xf32> to vector<2x8x16xbf16>
    %33 = arith.truncf %23 : vector<2x8x16xf32> to vector<2x8x16xbf16>
    %cst_25 = arith.constant dense<0.000000e+00> : vector<2x8x8xf32>
    %34 = tpu.matmul %32, %33, %cst_25 {dimension_numbers = #tpu.dot_dimension_numbers<[2], [2], [1], [1], [0, 0, 0, 1, 1, 1], [0], [0]>} : vector<2x8x16xbf16>, vector<2x8x16xbf16>, vector<2x8x8xf32> -> vector<2x8x8xf32>
    %c0_26 = arith.constant 0 : index
    %c0_27 = arith.constant 0 : index
    %c0_28 = arith.constant 0 : index
    %35 = vector.load %arg3[%c0_26, %c0_27, %c0_28] : memref<1x1x8xf32, #tpu.memory_space<vmem>>, vector<1x1x8xf32>
    %36 = vector.shape_cast %35 : vector<1x1x8xf32> to vector<1x8xf32>
    %37 = vector.shape_cast %36 : vector<1x8xf32> to vector<1x1x8xf32>
    %38 = vector.broadcast %37 : vector<1x1x8xf32> to vector<2x8x8xf32>
    %39 = arith.addf %34, %38 : vector<2x8x8xf32>
    %cst_29 = arith.constant dense<0xFF800000> : vector<2x8xf32>
    %40 = vector.multi_reduction <maximumf>, %39, %cst_29 [2] : vector<2x8x8xf32> to vector<2x8xf32>
    %41 = vector.shape_cast %40 : vector<2x8xf32> to vector<2x8x1xf32>
    %42 = vector.broadcast %41 : vector<2x8x1xf32> to vector<2x8x8xf32>
    %43 = arith.subf %39, %42 : vector<2x8x8xf32>
    %44 = math.exp %43 : vector<2x8x8xf32>
    %cst_30 = arith.constant dense<0.000000e+00> : vector<2x8xf32>
    %45 = vector.multi_reduction <add>, %44, %cst_30 [2] : vector<2x8x8xf32> to vector<2x8xf32>
    %46 = vector.shape_cast %45 : vector<2x8xf32> to vector<2x8x1xf32>
    %47 = tpu.reciprocal %46 {approx = true} : vector<2x8x1xf32> -> vector<2x8x1xf32>
    %48 = vector.broadcast %47 : vector<2x8x1xf32> to vector<2x8x8xf32>
    %49 = arith.mulf %44, %48 : vector<2x8x8xf32>
    %50 = arith.truncf %49 : vector<2x8x8xf32> to vector<2x8x8xbf16>
    %51 = arith.truncf %31 : vector<2x8x16xf32> to vector<2x8x16xbf16>
    %cst_31 = arith.constant dense<0.000000e+00> : vector<2x8x16xf32>
    %52 = tpu.matmul %50, %51, %cst_31 {dimension_numbers = #tpu.dot_dimension_numbers<[2], [1], [1], [2], [0, 0, 0, 1, 1, 2], [0], [0]>} : vector<2x8x8xbf16>, vector<2x8x16xbf16>, vector<2x8x16xf32> -> vector<2x8x16xf32>
    %53 = arith.truncf %52 : vector<2x8x16xf32> to vector<2x8x16xbf16>
    %c0_32 = arith.constant 0 : index
    %c0_33 = arith.constant 0 : index
    %c0_34 = arith.constant 0 : index
    %c0_35 = arith.constant 0 : index
    %54 = vector.load %arg12[%c0_32, %c0_33, %c0_34, %c0_35] : memref<1x2x16x32xbf16, #tpu.memory_space<vmem>>, vector<1x2x16x32xbf16>
    %55 = vector.shape_cast %54 : vector<1x2x16x32xbf16> to vector<2x16x32xbf16>
    %cst_36 = arith.constant dense<0.000000e+00> : vector<2x8x32xf32>
    %56 = tpu.matmul %53, %55, %cst_36 {dimension_numbers = #tpu.dot_dimension_numbers<[2], [1], [1], [2], [0, 0, 0, 1, 1, 2], [0], [0]>} : vector<2x8x16xbf16>, vector<2x16x32xbf16>, vector<2x8x32xf32> -> vector<2x8x32xf32>
    %cst_37 = arith.constant dense<0.000000e+00> : vector<8x32xf32>
    %57 = vector.multi_reduction <add>, %56, %cst_37 [0] : vector<2x8x32xf32> to vector<8x32xf32>
    %c0_38 = arith.constant 0 : index
    %c0_39 = arith.constant 0 : index
    %c0_40 = arith.constant 0 : index
    %58 = vector.load %arg13[%c0_38, %c0_39, %c0_40] : memref<1x1x32xf32, #tpu.memory_space<vmem>>, vector<1x1x32xf32>
    %59 = vector.shape_cast %58 : vector<1x1x32xf32> to vector<1x32xf32>
    %60 = vector.broadcast %59 : vector<1x32xf32> to vector<8x32xf32>
    %61 = arith.addf %57, %60 : vector<8x32xf32>
    %62 = arith.addf %3, %61 : vector<8x32xf32>
    %c0_41 = arith.constant 0 : index
    %c0_42 = arith.constant 0 : index
    %c0_43 = arith.constant 0 : index
    %63 = vector.load %arg14[%c0_41, %c0_42, %c0_43] : memref<1x1x32xf32, #tpu.memory_space<vmem>>, vector<1x1x32xf32>
    %64 = vector.shape_cast %63 : vector<1x1x32xf32> to vector<1x32xf32>
    %c0_44 = arith.constant 0 : index
    %c0_45 = arith.constant 0 : index
    %c0_46 = arith.constant 0 : index
    %65 = vector.load %arg15[%c0_44, %c0_45, %c0_46] : memref<1x1x32xf32, #tpu.memory_space<vmem>>, vector<1x1x32xf32>
    %66 = vector.shape_cast %65 : vector<1x1x32xf32> to vector<1x32xf32>
    %cst_47 = arith.constant dense<0.000000e+00> : vector<8xf32>
    %67 = vector.multi_reduction <add>, %62, %cst_47 [1] : vector<8x32xf32> to vector<8xf32>
    %68 = vector.shape_cast %67 : vector<8xf32> to vector<8x1xf32>
    %cst_48 = arith.constant 3.200000e+01 : f32
    %69 = vector.broadcast %cst_48 : f32 to vector<8x1xf32>
    %70 = arith.divf %68, %69 : vector<8x1xf32>
    %71 = vector.broadcast %70 : vector<8x1xf32> to vector<8x32xf32>
    %72 = arith.subf %62, %71 : vector<8x32xf32>
    %73 = arith.mulf %72, %72 : vector<8x32xf32>
    %cst_49 = arith.constant dense<0.000000e+00> : vector<8xf32>
    %74 = vector.multi_reduction <add>, %73, %cst_49 [1] : vector<8x32xf32> to vector<8xf32>
    %75 = vector.shape_cast %74 : vector<8xf32> to vector<8x1xf32>
    %cst_50 = arith.constant 3.200000e+01 : f32
    %76 = vector.broadcast %cst_50 : f32 to vector<8x1xf32>
    %77 = arith.divf %75, %76 : vector<8x1xf32>
    %cst_51 = arith.constant 9.99999996E-13 : f32
    %78 = vector.broadcast %cst_51 : f32 to vector<8x1xf32>
    %79 = arith.addf %77, %78 : vector<8x1xf32>
    %80 = math.rsqrt %79 : vector<8x1xf32>
    %81 = vector.broadcast %80 : vector<8x1xf32> to vector<8x32xf32>
    %82 = arith.mulf %72, %81 : vector<8x32xf32>
    %83 = vector.broadcast %64 : vector<1x32xf32> to vector<8x32xf32>
    %84 = arith.mulf %82, %83 : vector<8x32xf32>
    %85 = vector.broadcast %66 : vector<1x32xf32> to vector<8x32xf32>
    %86 = arith.addf %84, %85 : vector<8x32xf32>
    %87 = arith.truncf %86 : vector<8x32xf32> to vector<8x32xbf16>
    %c0_52 = arith.constant 0 : index
    %c0_53 = arith.constant 0 : index
    %c0_54 = arith.constant 0 : index
    %88 = vector.load %arg16[%c0_52, %c0_53, %c0_54] : memref<1x32x64xbf16, #tpu.memory_space<vmem>>, vector<1x32x64xbf16>
    %89 = vector.shape_cast %88 : vector<1x32x64xbf16> to vector<32x64xbf16>
    %cst_55 = arith.constant dense<0.000000e+00> : vector<8x64xf32>
    %90 = tpu.matmul %87, %89, %cst_55 {dimension_numbers = #tpu.dot_dimension_numbers<[1], [0], [0], [1], [0, 0, 1, 1], [], []>} : vector<8x32xbf16>, vector<32x64xbf16>, vector<8x64xf32> -> vector<8x64xf32>
    %c0_56 = arith.constant 0 : index
    %c0_57 = arith.constant 0 : index
    %c0_58 = arith.constant 0 : index
    %91 = vector.load %arg17[%c0_56, %c0_57, %c0_58] : memref<1x1x64xf32, #tpu.memory_space<vmem>>, vector<1x1x64xf32>
    %92 = vector.shape_cast %91 : vector<1x1x64xf32> to vector<1x64xf32>
    %93 = vector.broadcast %92 : vector<1x64xf32> to vector<8x64xf32>
    %94 = arith.addf %90, %93 : vector<8x64xf32>
    %95 = arith.mulf %94, %94 : vector<8x64xf32>
    %96 = arith.mulf %94, %95 : vector<8x64xf32>
    %cst_59 = arith.constant 4.471500e-02 : f32
    %97 = vector.broadcast %cst_59 : f32 to vector<8x64xf32>
    %98 = arith.mulf %97, %96 : vector<8x64xf32>
    %99 = arith.addf %94, %98 : vector<8x64xf32>
    %cst_60 = arith.constant 0.797884583 : f32
    %100 = vector.broadcast %cst_60 : f32 to vector<8x64xf32>
    %101 = arith.mulf %100, %99 : vector<8x64xf32>
    %102 = math.tanh %101 : vector<8x64xf32>
    %cst_61 = arith.constant 1.000000e+00 : f32
    %103 = vector.broadcast %cst_61 : f32 to vector<8x64xf32>
    %104 = arith.addf %103, %102 : vector<8x64xf32>
    %cst_62 = arith.constant 5.000000e-01 : f32
    %105 = vector.broadcast %cst_62 : f32 to vector<8x64xf32>
    %106 = arith.mulf %105, %104 : vector<8x64xf32>
    %107 = arith.mulf %94, %106 : vector<8x64xf32>
    %108 = arith.truncf %107 : vector<8x64xf32> to vector<8x64xbf16>
    %c0_63 = arith.constant 0 : index
    %c0_64 = arith.constant 0 : index
    %c0_65 = arith.constant 0 : index
    %109 = vector.load %arg18[%c0_63, %c0_64, %c0_65] : memref<1x64x32xbf16, #tpu.memory_space<vmem>>, vector<1x64x32xbf16>
    %110 = vector.shape_cast %109 : vector<1x64x32xbf16> to vector<64x32xbf16>
    %cst_66 = arith.constant dense<0.000000e+00> : vector<8x32xf32>
    %111 = tpu.matmul %108, %110, %cst_66 {dimension_numbers = #tpu.dot_dimension_numbers<[1], [0], [0], [1], [0, 0, 1, 1], [], []>} : vector<8x64xbf16>, vector<64x32xbf16>, vector<8x32xf32> -> vector<8x32xf32>
    %c0_67 = arith.constant 0 : index
    %c0_68 = arith.constant 0 : index
    %c0_69 = arith.constant 0 : index
    %112 = vector.load %arg19[%c0_67, %c0_68, %c0_69] : memref<1x1x32xf32, #tpu.memory_space<vmem>>, vector<1x1x32xf32>
    %113 = vector.shape_cast %112 : vector<1x1x32xf32> to vector<1x32xf32>
    %114 = vector.broadcast %113 : vector<1x32xf32> to vector<8x32xf32>
    %115 = arith.addf %111, %114 : vector<8x32xf32>
    %116 = arith.addf %86, %115 : vector<8x32xf32>
    %c0_70 = arith.constant 0 : index
    %c0_71 = arith.constant 0 : index
    %c0_72 = arith.constant 0 : index
    %117 = vector.load %arg20[%c0_70, %c0_71, %c0_72] : memref<1x1x32xf32, #tpu.memory_space<vmem>>, vector<1x1x32xf32>
    %118 = vector.shape_cast %117 : vector<1x1x32xf32> to vector<1x32xf32>
    %c0_73 = arith.constant 0 : index
    %c0_74 = arith.constant 0 : index
    %c0_75 = arith.constant 0 : index
    %119 = vector.load %arg21[%c0_73, %c0_74, %c0_75] : memref<1x1x32xf32, #tpu.memory_space<vmem>>, vector<1x1x32xf32>
    %120 = vector.shape_cast %119 : vector<1x1x32xf32> to vector<1x32xf32>
    %cst_76 = arith.constant dense<0.000000e+00> : vector<8xf32>
    %121 = vector.multi_reduction <add>, %116, %cst_76 [1] : vector<8x32xf32> to vector<8xf32>
    %122 = vector.shape_cast %121 : vector<8xf32> to vector<8x1xf32>
    %cst_77 = arith.constant 3.200000e+01 : f32
    %123 = vector.broadcast %cst_77 : f32 to vector<8x1xf32>
    %124 = arith.divf %122, %123 : vector<8x1xf32>
    %125 = vector.broadcast %124 : vector<8x1xf32> to vector<8x32xf32>
    %126 = arith.subf %116, %125 : vector<8x32xf32>
    %127 = arith.mulf %126, %126 : vector<8x32xf32>
    %cst_78 = arith.constant dense<0.000000e+00> : vector<8xf32>
    %128 = vector.multi_reduction <add>, %127, %cst_78 [1] : vector<8x32xf32> to vector<8xf32>
    %129 = vector.shape_cast %128 : vector<8xf32> to vector<8x1xf32>
    %cst_79 = arith.constant 3.200000e+01 : f32
    %130 = vector.broadcast %cst_79 : f32 to vector<8x1xf32>
    %131 = arith.divf %129, %130 : vector<8x1xf32>
    %cst_80 = arith.constant 9.99999996E-13 : f32
    %132 = vector.broadcast %cst_80 : f32 to vector<8x1xf32>
    %133 = arith.addf %131, %132 : vector<8x1xf32>
    %134 = math.rsqrt %133 : vector<8x1xf32>
    %135 = vector.broadcast %134 : vector<8x1xf32> to vector<8x32xf32>
    %136 = arith.mulf %126, %135 : vector<8x32xf32>
    %137 = vector.broadcast %118 : vector<1x32xf32> to vector<8x32xf32>
    %138 = arith.mulf %136, %137 : vector<8x32xf32>
    %139 = vector.broadcast %120 : vector<1x32xf32> to vector<8x32xf32>
    %140 = arith.addf %138, %139 : vector<8x32xf32>
    %c0_81 = arith.constant 0 : index
    %c0_82 = arith.constant 0 : index
    %141 = vector.load %arg25[%c0_81, %c0_82] : memref<8x32xf32, #tpu.memory_space<vmem>>, vector<8x32xf32>
    tpu.vector_store %arg25[%c0_81, %c0_82], %140 {strides = array<i32>} : memref<8x32xf32, #tpu.memory_space<vmem>>, vector<8x32xf32>,
    %c1_i32 = arith.constant 1 : i32
    %142 = arith.cmpi eq, %arg1, %c1_i32 : i32
    %143 = arith.extui %142 : i1 to i32
    %c0_i32_83 = arith.constant 0 : i32
    %144 = arith.cmpi ne, %143, %c0_i32_83 : i32
    scf.if %144 {
      %145 = vector.extract_strided_slice %140 {offsets = [0, 0], sizes = [1, 32], strides = [1, 1]} : vector<8x32xf32> to vector<1x32xf32>
      %c0_84 = arith.constant 0 : index
      %c0_85 = arith.constant 0 : index
      %146 = vector.load %arg22[%c0_84, %c0_85] : memref<32x128xf32, #tpu.memory_space<vmem>>, vector<32x128xf32>
      %cst_86 = arith.constant dense<0.000000e+00> : vector<1x128xf32>
      %147 = tpu.matmul %145, %146, %cst_86 {dimension_numbers = #tpu.dot_dimension_numbers<[1], [0], [0], [1], [0, 0, 1, 1], [], []>} : vector<1x32xf32>, vector<32x128xf32>, vector<1x128xf32> -> vector<1x128xf32>
      %c0_87 = arith.constant 0 : index
      %c0_88 = arith.constant 0 : index
      %148 = vector.load %arg23[%c0_87, %c0_88] : memref<1x128xf32, #tpu.memory_space<vmem>>, vector<1x128xf32>
      %149 = arith.addf %147, %148 : vector<1x128xf32>
      %c0_89 = arith.constant 0 : index
      %c0_90 = arith.constant 0 : index
      %c0_91 = arith.constant 0 : index
      %150 = vector.load %arg24[%c0_89, %c0_90, %c0_91] : memref<1x1x128xf32, #tpu.memory_space<vmem>>, vector<1x1x128xf32>
      %151 = vector.shape_cast %150 : vector<1x1x128xf32> to vector<1x128xf32>
      %152 = vector.shape_cast %149 : vector<1x128xf32> to vector<1x1x128xf32>
      tpu.vector_store %arg24[%c0_89, %c0_90, %c0_91], %152 {strides = array<i32>} : memref<1x1x128xf32, #tpu.memory_space<vmem>>, vector<1x1x128xf32>,
    } else {
    }
    return
  }
  func.func @transform_0(%arg0: i32, %arg1: i32) -> (i32, i32, i32) {
    %c0_i32 = arith.constant 0 : i32
    %c0_i32_0 = arith.constant 0 : i32
    %c0_i32_1 = arith.constant 0 : i32
    return %arg0, %c0_i32, %c0_i32_0 : i32, i32, i32
  }
  func.func @transform_1(%arg0: i32, %arg1: i32) -> (i32, i32, i32) {
    %c0_i32 = arith.constant 0 : i32
    %c0_i32_0 = arith.constant 0 : i32
    %c0_i32_1 = arith.constant 0 : i32
    return %arg0, %c0_i32, %c0_i32_0 : i32, i32, i32
  }
  func.func @transform_2(%arg0: i32, %arg1: i32) -> (i32, i32) {
    %c0_i32 = arith.constant 0 : i32
    %c0_i32_0 = arith.constant 0 : i32
    %c0_i32_1 = arith.constant 0 : i32
    return %c0_i32, %c0_i32_0 : i32, i32
  }
  func.func @transform_3(%arg0: i32, %arg1: i32) -> (i32, i32) {
    %c0_i32 = arith.constant 0 : i32
    %c0_i32_0 = arith.constant 0 : i32
    %c0_i32_1 = arith.constant 0 : i32
    return %c0_i32, %c0_i32_0 : i32, i32
  }
  func.func @transform_4(%arg0: i32, %arg1: i32) -> (i32, i32, i32, i32) {
    %c0_i32 = arith.constant 0 : i32
    %c0_i32_0 = arith.constant 0 : i32
    %c0_i32_1 = arith.constant 0 : i32
    %c0_i32_2 = arith.constant 0 : i32
    return %arg1, %c0_i32, %c0_i32_0, %c0_i32_1 : i32, i32, i32, i32
  }
  func.func @transform_5(%arg0: i32, %arg1: i32) -> (i32, i32, i32) {
    %c0_i32 = arith.constant 0 : i32
    %c0_i32_0 = arith.constant 0 : i32
    %c0_i32_1 = arith.constant 0 : i32
    return %arg1, %c0_i32, %c0_i32_0 : i32, i32, i32
  }
  func.func @transform_6(%arg0: i32, %arg1: i32) -> (i32, i32, i32, i32) {
    %c0_i32 = arith.constant 0 : i32
    %c0_i32_0 = arith.constant 0 : i32
    %c0_i32_1 = arith.constant 0 : i32
    %c0_i32_2 = arith.constant 0 : i32
    return %arg1, %c0_i32, %c0_i32_0, %c0_i32_1 : i32, i32, i32, i32
  }
  func.func @transform_7(%arg0: i32, %arg1: i32) -> (i32, i32, i32) {
    %c0_i32 = arith.constant 0 : i32
    %c0_i32_0 = arith.constant 0 : i32
    %c0_i32_1 = arith.constant 0 : i32
    return %arg1, %c0_i32, %c0_i32_0 : i32, i32, i32
  }
  func.func @transform_8(%arg0: i32, %arg1: i32) -> (i32, i32, i32, i32) {
    %c0_i32 = arith.constant 0 : i32
    %c0_i32_0 = arith.constant 0 : i32
    %c0_i32_1 = arith.constant 0 : i32
    %c0_i32_2 = arith.constant 0 : i32
    return %arg1, %c0_i32, %c0_i32_0, %c0_i32_1 : i32, i32, i32, i32
  }
  func.func @transform_9(%arg0: i32, %arg1: i32) -> (i32, i32, i32) {
    %c0_i32 = arith.constant 0 : i32
    %c0_i32_0 = arith.constant 0 : i32
    %c0_i32_1 = arith.constant 0 : i32
    return %arg1, %c0_i32, %c0_i32_0 : i32, i32, i32
  }
  func.func @transform_10(%arg0: i32, %arg1: i32) -> (i32, i32, i32, i32) {
    %c0_i32 = arith.constant 0 : i32
    %c0_i32_0 = arith.constant 0 : i32
    %c0_i32_1 = arith.constant 0 : i32
    %c0_i32_2 = arith.constant 0 : i32
    return %arg1, %c0_i32, %c0_i32_0, %c0_i32_1 : i32, i32, i32, i32
  }
  func.func @transform_11(%arg0: i32, %arg1: i32) -> (i32, i32, i32) {
    %c0_i32 = arith.constant 0 : i32
    %c0_i32_0 = arith.constant 0 : i32
    %c0_i32_1 = arith.constant 0 : i32
    return %arg1, %c0_i32, %c0_i32_0 : i32, i32, i32
  }
  func.func @transform_12(%arg0: i32, %arg1: i32) -> (i32, i32, i32) {
    %c0_i32 = arith.constant 0 : i32
    %c0_i32_0 = arith.constant 0 : i32
    %c0_i32_1 = arith.constant 0 : i32
    return %arg1, %c0_i32, %c0_i32_0 : i32, i32, i32
  }
  func.func @transform_13(%arg0: i32, %arg1: i32) -> (i32, i32, i32) {
    %c0_i32 = arith.constant 0 : i32
    %c0_i32_0 = arith.constant 0 : i32
    %c0_i32_1 = arith.constant 0 : i32
    return %arg1, %c0_i32, %c0_i32_0 : i32, i32, i32
  }
  func.func @transform_14(%arg0: i32, %arg1: i32) -> (i32, i32, i32) {
    %c0_i32 = arith.constant 0 : i32
    %c0_i32_0 = arith.constant 0 : i32
    %c0_i32_1 = arith.constant 0 : i32
    return %arg1, %c0_i32, %c0_i32_0 : i32, i32, i32
  }
  func.func @transform_15(%arg0: i32, %arg1: i32) -> (i32, i32, i32) {
    %c0_i32 = arith.constant 0 : i32
    %c0_i32_0 = arith.constant 0 : i32
    %c0_i32_1 = arith.constant 0 : i32
    return %arg1, %c0_i32, %c0_i32_0 : i32, i32, i32
  }
  func.func @transform_16(%arg0: i32, %arg1: i32) -> (i32, i32, i32) {
    %c0_i32 = arith.constant 0 : i32
    %c0_i32_0 = arith.constant 0 : i32
    %c0_i32_1 = arith.constant 0 : i32
    return %arg1, %c0_i32, %c0_i32_0 : i32, i32, i32
  }
  func.func @transform_17(%arg0: i32, %arg1: i32) -> (i32, i32, i32) {
    %c0_i32 = arith.constant 0 : i32
    %c0_i32_0 = arith.constant 0 : i32
    %c0_i32_1 = arith.constant 0 : i32
    return %arg1, %c0_i32, %c0_i32_0 : i32, i32, i32
  }
  func.func @transform_18(%arg0: i32, %arg1: i32) -> (i32, i32, i32) {
    %c0_i32 = arith.constant 0 : i32
    %c0_i32_0 = arith.constant 0 : i32
    %c0_i32_1 = arith.constant 0 : i32
    return %arg1, %c0_i32, %c0_i32_0 : i32, i32, i32
  }
  func.func @transform_19(%arg0: i32, %arg1: i32) -> (i32, i32, i32) {
    %c0_i32 = arith.constant 0 : i32
    %c0_i32_0 = arith.constant 0 : i32
    %c0_i32_1 = arith.constant 0 : i32
    return %arg1, %c0_i32, %c0_i32_0 : i32, i32, i32
  }
  func.func @transform_20(%arg0: i32, %arg1: i32) -> (i32, i32) {
    %c0_i32 = arith.constant 0 : i32
    %c0_i32_0 = arith.constant 0 : i32
    %c0_i32_1 = arith.constant 0 : i32
    return %c0_i32, %c0_i32_0 : i32, i32
  }
  func.func @transform_21(%arg0: i32, %arg1: i32) -> (i32, i32) {
    %c0_i32 = arith.constant 0 : i32
    %c0_i32_0 = arith.constant 0 : i32
    %c0_i32_1 = arith.constant 0 : i32
    return %c0_i32, %c0_i32_0 : i32, i32
  }
  func.func @transform_22(%arg0: i32, %arg1: i32) -> (i32, i32, i32) {
    %c0_i32 = arith.constant 0 : i32
    %c0_i32_0 = arith.constant 0 : i32
    %c0_i32_1 = arith.constant 0 : i32
    return %arg0, %c0_i32, %c0_i32_0 : i32, i32, i32
  }
}

</mosaic_0001>

<bundles_post_ra>
// kernel: forward.1
= control target key start
LH: loop header
LB: loop body
LE: loop exit
PB: predicated region body
PF: predicated region fallthrough
CT: control target
= control target key end

     0   :  { %s3338_s0 = inlined_call_operand.vmem [shape: f32[2,8,32], index: 0, kind: input, shape index: {}]   ;;  %s3339_s1 = inlined_call_operand.vmem [shape: f32[2,1,8], index: 1, kind: input, shape index: {}]   ;;  %s3340_s2 = inlined_call_operand.vmem [shape: f32[1,32], index: 2, kind: input, shape index: {}]   ;;  %s3341_s3 = inlined_call_operand.vmem [shape: f32[1,32], index: 3, kind: input, shape index: {}]   ;;  %s3342_s4 = inlined_call_operand.vmem [shape: bf16[2,2,32,16], index: 4, kind: input, shape index: {}]   ;;  %s3343_s5 = inlined_call_operand.vmem [shape: f32[2,2,16], index: 5, kind: input, shape index: {}]   ;;  %s3344_s6 = inlined_call_operand.vmem [shape: bf16[2,2,32,16], index: 6, kind: input, shape index: {}]   ;;  %s3345_s7 = inlined_call_operand.vmem [shape: f32[2,2,16], index: 7, kind: input, shape index: {}]   ;;  %s3346_s8 = inlined_call_operand.vmem [shape: bf16[2,2,32,16], index: 8, kind: input, shape index: {}]   ;;  %s3347_s9 = inlined_call_operand.vmem [shape: f32[2,2,16], index: 9, kind: input, shape index: {}]   ;;  %s3348_s10 = inlined_call_operand.vmem [shape: bf16[2,2,16,32], index: 10, kind: input, shape index: {}]   ;;  %s3349_s11 = inlined_call_operand.vmem [shape: f32[2,1,32], index: 11, kind: input, shape index: {}]   ;;  %s3350_s12 = inlined_call_operand.vmem [shape: f32[2,1,32], index: 12, kind: input, shape index: {}]   ;;  %s3351_s13 = inlined_call_operand.vmem [shape: f32[2,1,32], index: 13, kind: input, shape index: {}]   ;;  %s3352_s14 = inlined_call_operand.vmem [shape: bf16[2,32,64], index: 14, kind: input, shape index: {}]   ;;  %s3353_s15 = inlined_call_operand.vmem [shape: f32[2,1,64], index: 15, kind: input, shape index: {}]   ;;  %s3354_s16 = inlined_call_operand.vmem [shape: bf16[2,64,32], index: 16, kind: input, shape index: {}]   ;;  %s3355_s17 = inlined_call_operand.vmem [shape: f32[2,1,32], index: 17, kind: input, shape index: {}]   ;;  %s3356_s18 = inlined_call_operand.vmem [shape: f32[2,1,32], index: 18, kind: input, shape index: {}]   ;;  %s3357_s19 = inlined_call_operand.vmem [shape: f32[2,1,32], index: 19, kind: input, shape index: {}]   ;;  %s3358_s20 = inlined_call_operand.vmem [shape: f32[32,128], index: 20, kind: input, shape index: {}]   ;;  %s3359_s21 = inlined_call_operand.vmem [shape: f32[1,128], index: 21, kind: input, shape index: {}]   ;;  %s3360_s22 = inlined_call_operand.hbm [shape: f32[2,1,128], index: 22, kind: output, shape index: {}]  }
   0x1   :  { %3378 = sst [smem:[#allocation21_spill]] %s3338_s0 }
   0x2   :  { %3379 = sst [smem:[#allocation22_spill]] %s3339_s1 }
   0x3   :  { %3380 = sst [smem:[#allocation23_spill]] %s3340_s2 }
   0x4   :  { %3381 = sst [smem:[#allocation24_spill]] %s3341_s3 }
   0x5   :  { %3382 = sst [smem:[#allocation25_spill]] %s3342_s4 }
   0x6   :  { %3383 = sst [smem:[#allocation26_spill]] %s3343_s5 }
   0x7   :  { %3384 = sst [smem:[#allocation27_spill]] %s3344_s6 }
   0x8   :  { %3385 = sst [smem:[#allocation28_spill]] %s3345_s7 }
   0x9   :  { %3386 = sst [smem:[#allocation29_spill]] %s3346_s8 }
   0xa   :  { %3387 = sst [smem:[#allocation30_spill]] %s3348_s10 }
   0xb   :  { %3388 = sst [smem:[#allocation31_spill]] %s3350_s12 }
   0xc   :  { %3389 = sst [smem:[#allocation32_spill]] %s3351_s13 }
   0xd   :  { %3390 = sst [smem:[#allocation33_spill]] %s3352_s14 }
   0xe   :  { %3391 = sst [smem:[#allocation34_spill]] %s3355_s17 }
   0xf   :  { %3392 = sst [smem:[#allocation35_spill]] %s3356_s18 }
  0x10   :  { %3393 = sst [smem:[#allocation36_spill]] %s3357_s19 }
  0x11   :  { %3394 = sst [smem:[#allocation37_spill]] %s3358_s20 }
  0x12   :  { %3395 = sst [smem:[#allocation38_spill]] %s3359_s21 }
  0x13   :  { %3396 = sst [smem:[#allocation39_spill]] %s3360_s22 }
  0x14   :  { %27 = vsyncpa [#allocation4], 0 }
  0x15   :  { %29 = vsyncpa [#allocation4 + $0x1], 0  ;;  %s2933_s3 = smov 0   ;;  %s2935_s28 = smov 0  }
  0x16   :  { %s2937_s29 = smov 0   ;;  %s2939_s30 = smov 0  }
  0x17   :  { %s2941_s4 = smov 0   ;;  %s2943_s0 = smov 0  }
  0x18   :  { %s2945_s23 = smov 0   ;;  %s2947_s1 = smov 0  }
  0x19 LB: > { %3397 = sst [smem:[#allocation6_spill]] %s2781_s3  ;;  %s2358_s5 = sadd.s32 4294967295, %s2809_s1   ;;  %s2809_s1 = sphi %s2947_s1, %s35_s1   ;;  %s2805_s23 = sphi %s2945_s23, %s3465_s23   ;;  %s2801_s0 = sphi %s2943_s0, %s3464_s0   ;;  %s2797_s4 = sphi %s2941_s4, %s3463_s4   ;;  %s2793_s30 = sphi %s2939_s30, %s3462_s30   ;;  %s2789_s29 = sphi %s2937_s29, %s3461_s29   ;;  %s2785_s28 = sphi %s2935_s28, %s3467_s28   ;;  %s2781_s3 = sphi %s2933_s3, %s3466_s3  }
  0x1a   : > { %3398 = sst [smem:[#allocation7_spill]] %s2789_s29  ;;  %s2359_s24 = sadd.s32 4294967294, %s2809_s1  }
  0x1b   : > { %3399 = sst [smem:[#allocation8_spill]] %s2793_s30  ;;  %s44_s6 = sadd.s32 1, %s2801_s0 }
  0x1c   : > { %3400 = sst [smem:[#allocation9_spill]] %s2797_s4  ;;  %p45_p0 = scmp.ge.s32.totalorder %s44_s6, 2 }
  0x1d   : > { %3401 = sst [smem:[#allocation10_spill]] %s2801_s0  ;;  %s47_s25 = sadd.s32 1, %s2805_s23 }
  0x1e   : > { %3402 = sst [smem:[#allocation11_spill]] %s2805_s23  ;;  %p616_p1 = scmp.ne.s32.totalorder %s2789_s29, %s2785_s28 }
  0x1f   : > { %3403 = sst [smem:[#allocation12_spill]] %s2809_s1  ;;  %p617_p2 = scmp.eq.s32.totalorder %s2358_s5, 3 }
  0x20   : > { %s3469_s6 = smov (%p45_p0, %s44_s6), 0  ;;  %s3471_s25 = smov (!%p45_p0, %s47_s25), %s2805_s23 }
  0x21   : > { %3404 = sst [smem:[#allocation13_spill]] %s3469_s6  ;;  %p2982_p3 = por %p617_p2, %p616_p1 }
  0x22   : > { %p622_p4 = scmp.ne.s32.totalorder %s2785_s28, %s2781_s3  ;;  %p49_p5 = scmp.ge.s32.totalorder %s3471_s25, 2 }
  0x23   : > { %s3405_s26 = scalar_select %p2982_p3, 1, 0 }
  0x24   : > { %p623_p6 = scmp.eq.s32.totalorder %s2359_s24, 3  ;;  %p2362_p7 = scmp.ge.s32.totalorder %s2809_s1, 1 }
  0x25   : > { %3406 = sst [smem:[#allocation14_spill]] %s3405_s26  ;;  %p777_p8 = scmp.lt.s32.totalorder %s2809_s1, 5 }
  0x26   : > { %s3473_s25 = smov (%p49_p5, %s3471_s25), 0  ;;  %p2992_p9 = por %p623_p6, %p622_p4 }
  0x27   : > { %3407 = sst [smem:[#allocation15_spill]] %s3473_s25  ;;  %p778_p10 = pnand %p2362_p7, %p777_p8 }
  0x28   : > { %s3408_s2 = scalar_select %p2992_p9, 1, 0 }
  0x29   : > { %s603_s27 = ssub.s32 %s2805_s23, %s3473_s25  ;;  %s606_s5 = sadd.s32 1, %s2789_s29 }
  0x2a   : > { %3409 = sst [smem:[#allocation16_spill]] %s3408_s2  ;;  %p604_p11 = scmp.eq.s32.totalorder %s603_s27, 0 }
  0x2b   : > { %781 = sbr.rel (%p778_p10) target bundleno = 2928 (0xb70), region = 108 }
  0x2c   : > { %s3000_s6 = scalar_select %p604_p11, %s2789_s29, %s606_s5  }
  0x2e   : > { %3410 = sst [smem:[#allocation17_spill]] %s3000_s6 }
  0x32   : > { %p903_p12 = scmp.lt.s32.totalorder %s2797_s4, 1  ;;  %p910_p13 = scmp.lt.s32.totalorder %s2793_s30, 1 }
  0x33   : > { %s3413_s3 = sld [smem:[#allocation21_spill]]  ;;  %s3414_s21 = sld [smem:[#allocation25_spill]] }
  0x34   : > { %s3006_s0 = scalar_select %p903_p12, %s2797_s4, 1 }
  0x35   : > { %s3009_s2 = scalar_select %p910_p13, %s2793_s30, 1 }
  0x36   : > { %3411 = sst [smem:[#allocation18_spill]] %s3006_s0  ;;  %s2363_s27 = sshll.u32 %s3006_s0, 3 }
  0x37   : > { %s2432_s22 = sshll.u32 %s3009_s2, 5  ;;  %s3026_s30 = sshll.u32 %s3009_s2, 1 }
  0x38   : > { %s3417_s24 = sld [smem:[#allocation27_spill]]  ;;  %s3419_s8 = sld [smem:[#allocation29_spill]] }
  0x39   : > { %s906_s1 = scalar_lea.vmem %s3413_s3, %s2363_s27  ;;  %s3023_s20 = scalar_lea.vmem %s3414_s21, %s2432_s22 }
  0x3a   : > { %3415 = sst [smem:[#allocation19_spill]] %s3023_s20  ;;  %s2435_s25 = sshll.u32 %s3009_s2, 4 }
  0x3b   : > { %s3420_s10 = sld [smem:[#allocation30_spill]]  ;;  %s3424_s14 = sld [smem:[#allocation33_spill]] }
  0x3c   : > { %s3425_s6 = sld [smem:[#allocation34_spill]]  ;;  %s3426_s7 = sld [smem:[#allocation35_spill]] }
  0x3d   : > { %s3427_s19 = sld [smem:[#allocation36_spill]]  ;;  %s3428_s12 = sand.u32 1, %s2785_s28  }
  0x3e   : > { %s3035_s27 = scalar_lea.vmem %s3417_s24, %s2432_s22  ;;  %s3044_s0 = scalar_lea.vmem %s3419_s8, %s2432_s22 }
  0x3f   : > { %s3080_s24 = scalar_lea.vmem %s3354_s16, %s2432_s22  ;;  %s3096_s17 = scalar_lea.vmem [#allocation3], %s3428_s12 }
  0x40   : > { %s3429_s29 = sld [smem:[#allocation8_spill]] }
  0x41   : > { %s3054_s23 = scalar_lea.vmem %s3420_s10, %s2435_s25  ;;  %s3071_s20 = scalar_lea.vmem %s3424_s14, %s2435_s25 }
  0x42   : > { %3421 = sst [smem:[#allocation20_spill]] %s3054_s23  ;;  %s958_s10 = scalar_lea.vmem %s3353_s15, %s3009_s2 }
  0x43   : > { %s966_s4 = scalar_lea.vmem %s3425_s6, %s3009_s2  ;;  %s969_s13 = scalar_lea.vmem %s3426_s7, %s3009_s2 }
  0x44   : > { %s972_s14 = scalar_lea.vmem %s3427_s19, %s3009_s2 }
  0x46   : > { %p2379_p0 = scmp.ne.s32.totalorder %s3429_s29, 0 }
  0x47   : > { %v978_v0 = vld [vmem:[%s906_s1] sm:$0xff] (!%p2379_p0)  ;;  %vm981_vm0 = vcmask (!%p2379_p0), 261120   ;;  %s3430_s22 = sld [smem:[#allocation23_spill]] (!%p2379_p0)  ;;  %s3431_s6 = sld [smem:[#allocation24_spill]] (!%p2379_p0) }
  0x48   : > { %977 = sbr.rel (%p2379_p0) target bundleno = 386 (0x182), region = 112  ;;  %v982_v1 = vsel (!%p2379_p0), %vm981_vm0, %v978_v0, 0.0 }
  0x49   : > { %983 = vadd.xlane.f32.xlu0 (!%p2379_p0), %v982_v1 }
  0x4d   : > { %v2380_v11 = vld [vmem:[%s3430_s22] ss:$0 sm:$0xff] (!%p2379_p0) }
  0x4e   : > { %v2381_v13 = vld [vmem:[%s3431_s6] ss:$0 sm:$0xff] (!%p2379_p0) }
  0xd6   : > { %v984_v2 = vpop.xlane.xlu0 %983 }
  0xd7   : > { %v986_v3 = vmul.f32 0.03125, %v984_v2 }
  0xd9   : > { %v987_v4 = vsub.f32 %v978_v0, %v986_v3 }
  0xdb   : > { %v988_v5 = vmul.f32 %v987_v4, %v987_v4 }
  0xdd   : > { %v989_v6 = vsel %vm981_vm0, %v988_v5, 0.0 }
  0xde   : > { %990 = vadd.xlane.f32.xlu0 %v989_v6 }
 0x16b   : > { %v991_v7 = vpop.xlane.xlu0 %990 }
 0x16c   : > { %v992_v8 = vmul.f32 0.03125, %v991_v7 }
 0x16e   : > { %v993_v9 = vadd.f32 1e-12, %v992_v8 }
 0x170   : > { %2679 = vrsqrt.f32 %v993_v9 }
 0x17a   : > { %v2680_v10 = vpop.eup %2679 }
 0x17b   : > { %v995_v12 = vmul.f32 %v2680_v10, %v987_v4 }
 0x17d   : > { %v1002_v14 = vmul.f32 %v2380_v11, %v995_v12 }
 0x17f   : > { %v1009_v15 = vadd.f32 %v2381_v13, %v1002_v14 }
 0x181   : > { %1010 = vst.msk [vmem:[#allocation2] sm:$0xff] %vm981_vm0, %v1009_v15 }
 0x182 PF: > { %s3432_s3 = sld [smem:[#allocation19_spill]]  ;;  %v2811_v17 = vmov 0.0   ;;  %vm2812_vm1 = vmmov 0   ;;  %vm1067_vm2 = vcmask 261120   ;;  %v2685_v23 = vld [vmem:[%s3035_s27] sm:$0xff]   ;;  %v2686_v24 = vld [vmem:[%s3035_s27 + $0x10] sm:$0xff]   ;;  %v1034_v33 = vlaneseq  ;;  %s3437_s7 = scalar_lea.vmem %s3347_s9, %s3026_s30 }
 0x183   : > { %2481 = vmatprep.subr.bf16.mxu0 %v2811_v17  ;;  %2489 = vmatprep.subr.bf16.mxu1 %v2811_v17  ;;  %v2687_v25 = vld [vmem:[%s3035_s27 + $0x8] sm:$0xff]   ;;  %v2688_v26 = vld [vmem:[%s3035_s27 + $0x18] sm:$0xff]   ;;  %v2689_v27 = vld [vmem:[%s3044_s0] sm:$0xff]   ;;  %v2813_v31 = vmov 1966171168   ;;  %s3433_s26 = sld [smem:[#allocation28_spill]]  ;;  %s3442_s27 = scalar_lea.vmem %s3349_s11, %s3009_s2 }
 0x184   : > { %2485 = vmatprep.mubr.msk.bf16.mxu0 %vm2812_vm1, %v2811_v17  ;;  %2493 = vmatprep.mubr.msk.bf16.mxu1 %vm2812_vm1, %v2811_v17  ;;  %v2690_v28 = vld [vmem:[%s3044_s0 + $0x10] sm:$0xff]   ;;  %v2691_v29 = vld [vmem:[%s3044_s0 + $0x8] sm:$0xff]   ;;  %v2692_v30 = vld [vmem:[%s3044_s0 + $0x18] sm:$0xff]   ;;  %v1032_v32 = vunpack.c.l.s4 %v2813_v31  ;;  %v1035_v35 = vshrl.u32 %v1034_v33, 7  ;;  %s3435_s18 = sld [smem:[#allocation26_spill]]  ;;  %vm1466_vm3 = vcmask 130048  }
 0x185   : > { %v2396_v12 = vld.sshfl [vmem:[%s3437_s7] sm:$0x11 pattern:$0x75316420]  ;;  %s3438_s12 = sld [smem:[#allocation18_spill]]  ;;  %vm1589_vm4 = vcmask 1043456  }
 0x186   : > { %v1033_v34 = vunpack.c.0.s8 %v1032_v32  ;;  %v1047_v43 = vsub.s32 0, %v1035_v35  ;;  %v1326_v13 = vcombine.high %v2396_v12, %v2396_v12  ;;  %s3439_s1 = sld [smem:[#allocation22_spill]]  ;;  %vm1559_vm5 = vcmask 64512   ;;  %s3443_s8 = sld [smem:[#allocation31_spill]] }
 0x187   : > { %s3441_s6 = sld [smem:[#allocation20_spill]]  ;;  %vm1941_vm6 = vcmask 523264  }
 0x188   : > { %v2681_v16 = vld [vmem:[%s3432_s3] sm:$0xff]   ;;  %v2682_v18 = vld [vmem:[%s3432_s3 + $0x10] sm:$0xff]   ;;  %v2683_v19 = vld [vmem:[%s3432_s3 + $0x8] sm:$0xff]   ;;  %v1036_v38 = vsub.s32 %v1033_v34, %v1035_v35 }
 0x189   : > { %2482 = vmatpush3.bf16.msra.mxu0 %v2681_v16  ;;  %2490 = vmatpush3.bf16.msra.mxu1 %v2682_v18  ;;  %v2684_v20 = vld [vmem:[%s3432_s3 + $0x18] sm:$0xff]   ;;  %v3120_v21 = vld [vmem:[#allocation2] sm:$0xff]  ;;  %s3434_s21 = scalar_lea.vmem %s3433_s26, %s3026_s30  ;;  %s3450_s3 = sld [smem:[#allocation8_spill]] }
 0x18a   : > { %2483 = vmatprep.subr.bf16.mxu0 %v2811_v17  ;;  %2491 = vmatprep.subr.bf16.mxu1 %v2811_v17  ;;  %v1012_v22 = vpack.c.bf16 %v3120_v21, %v3120_v21  ;;  %v2389_v36 = vld.sshfl [vmem:[%s3434_s21] sm:$0x11 pattern:$0x75316420]  ;;  %s3436_s25 = scalar_lea.vmem %s3435_s18, %s3026_s30  ;;  %v1333_v14 = vrot.slane %v2396_v12, %v1036_v38  ;;  %v1340_v15 = vrot.slane %v1326_v13, %v1036_v38 }
 0x18b   : > { %v1180_v37 = vcombine.high %v2389_v36, %v2389_v36  ;;  %v1187_v42 = vrot.slane %v2389_v36, %v1036_v38  ;;  %v2382_v47 = vld.sshfl [vmem:[%s3436_s25] sm:$0x11 pattern:$0x75316420] }
 0x18c   : > { %v1030_v50 = vcombine.high %v2382_v47, %v2382_v47  ;;  %v1037_v54 = vrot.slane %v2382_v47, %v1036_v38  ;;  %v1344_v16 = vrot.slane %v1333_v14, %v1047_v43  ;;  %v1348_v18 = vrot.slane %v1340_v15, %v1047_v43  ;;  %s3440_s23 = scalar_lea.vmem %s3439_s1, %s3438_s12  ;;  %s3444_s5 = scalar_lea.vmem %s3443_s8, %s3009_s2 }
 0x18d   : > { %2484 = vmatpush3.bf16.msra.mxu0 %v2683_v19  ;;  %2492 = vmatpush3.bf16.msra.mxu1 %v2684_v20  ;;  %v1194_v46 = vrot.slane %v1180_v37, %v1036_v38  ;;  %v1198_v52 = vrot.slane %v1187_v42, %v1047_v43  ;;  %v2403_v34 = vld [vmem:[%s3440_s23] ss:$0 sm:$0xff] }
 0x18e   : > { %2497 = vmatprep.subr.bf16.mxu0 %v2811_v17  ;;  %2505 = vmatprep.subr.bf16.mxu1 %v2811_v17  ;;  %v1044_v55 = vrot.slane %v1030_v50, %v1036_v38  ;;  %v1048_v63 = vrot.slane %v1037_v54, %v1047_v43 }
 0x18f   : > { %v1202_v53 = vrot.slane %v1194_v46, %v1047_v43  ;;  %p2427_p1 = scmp.ne.s32.totalorder %s3450_s3, 1 }
 0x190   : > { %2486 = vmatmul.mubr.msk.bf16.vlgmr.msra.gmra.mrb[0].mxu0 %vm1067_vm2, %v1012_v22  ;;  %2494 = vmatmul.mubr.msk.bf16.vlgmr.msra.gmra.mrb[0].mxu1 %vm1067_vm2, %v1012_v22  ;;  %v1052_v3 = vrot.slane %v1044_v55, %v1047_v43  ;;  %s3451_s26 = sld [smem:[#allocation37_spill]] (!%p2427_p1)  ;;  %vm2815_vm7 = vmmov (!%p2427_p1), 0  }
 0x191   : > { %2498 = vmatpush3.bf16.msra.mxu0 %v2685_v23  ;;  %2506 = vmatpush3.bf16.msra.mxu1 %v2686_v24 }
 0x192   : > { %2499 = vmatprep.subr.bf16.mxu0 %v2811_v17  ;;  %2507 = vmatprep.subr.bf16.mxu1 %v2811_v17 }
 0x193   : > { %2501 = vmatprep.mubr.msk.bf16.mxu0 %vm2812_vm1, %v2811_v17  ;;  %2509 = vmatprep.mubr.msk.bf16.mxu1 %vm2812_vm1, %v2811_v17 }
 0x195   : > { %2500 = vmatpush3.bf16.msra.mxu0 %v2687_v25  ;;  %2508 = vmatpush3.bf16.msra.mxu1 %v2688_v26 }
 0x196   : > { %2513 = vmatprep.subr.bf16.mxu0 %v2811_v17  ;;  %2521 = vmatprep.subr.bf16.mxu1 %v2811_v17 }
 0x198   : > { %2502 = vmatmul.mubr.msk.bf16.vlgmr.msra.gmra.mrb[4].mxu0 %vm1067_vm2, %v1012_v22  ;;  %2510 = vmatmul.mubr.msk.bf16.vlgmr.msra.gmra.mrb[4].mxu1 %vm1067_vm2, %v1012_v22 }
 0x199   : > { %2517 = vmatprep.mubr.msk.bf16.mxu0 %vm2812_vm1, %v2811_v17  ;;  %2525 = vmatprep.mubr.msk.bf16.mxu1 %vm2812_vm1, %v2811_v17 }
 0x19a   : > { %2514 = vmatpush3.bf16.msra.mxu0 %v2689_v27  ;;  %2522 = vmatpush3.bf16.msra.mxu1 %v2690_v28 }
 0x19b   : > { %2515 = vmatprep.subr.bf16.mxu0 %v2811_v17  ;;  %2523 = vmatprep.subr.bf16.mxu1 %v2811_v17 }
 0x19e   : > { %2516 = vmatpush3.bf16.msra.mxu0 %v2691_v29  ;;  %2524 = vmatpush3.bf16.msra.mxu1 %v2692_v30 }
 0x19f   : > { %2529 = vmatprep.subr.bf16.mxu0 %v2811_v17  ;;  %2535 = vmatprep.subr.bf16.mxu1 %v2811_v17 }
 0x1a1   : > { %2518 = vmatmul.mubr.msk.bf16.vlgmr.msra.gmra.mrb[8].mxu0 %vm1067_vm2, %v1012_v22  ;;  %2526 = vmatmul.mubr.msk.bf16.vlgmr.msra.gmra.mrb[8].mxu1 %vm1067_vm2, %v1012_v22 }
 0x1a2   : > { %2531 = vmatprep.mubr.msk.bf16.mxu0 %vm2812_vm1, %v2811_v17  ;;  %2537 = vmatprep.mubr.msk.bf16.mxu1 %vm2812_vm1, %v2811_v17 }
 0x263   : > { %v1105_v39 = vpop.f32.mrb[0].mxu0  ;;  %v1157_v41 = vpop.f32.mrb[0].mxu1 }
 0x264   : > { %v2487_v40 = vpop.f32.mrb[1].mxu0  ;;  %v2495_v45 = vpop.f32.mrb[1].mxu1  ;;  %v1106_v8 = vadd.f32 %v1105_v39, %v1048_v63  ;;  %v1158_v9 = vadd.f32 %v1157_v41, %v1052_v3 }
 0x265   : > { %v1108_v44 = vpop.f32.mrb[2].mxu0  ;;  %v1160_v49 = vpop.f32.mrb[2].mxu1 }
 0x266   : > { %v2488_v48 = vpop.f32.mrb[3].mxu0  ;;  %v2496_v51 = vpop.f32.mrb[3].mxu1  ;;  %v1455_v10 = vpack.c.bf16 %v1106_v8, %v1106_v8  ;;  %v1456_v11 = vpack.c.bf16 %v1158_v9, %v1158_v9 }
 0x26b   : > { %v1251_v56 = vpop.f32.mrb[4].mxu0  ;;  %v1303_v58 = vpop.f32.mrb[4].mxu1 }
 0x26c   : > { %v1252_v57 = vadd.f32 %v1251_v56, %v1198_v52  ;;  %v2503_v59 = vpop.f32.mrb[5].mxu0  ;;  %v1304_v60 = vadd.f32 %v1303_v58, %v1202_v53  ;;  %v2511_v62 = vpop.f32.mrb[5].mxu1 }
 0x26d   : > { %v1254_v61 = vpop.f32.mrb[6].mxu0  ;;  %v1306_v2 = vpop.f32.mrb[6].mxu1 }
 0x26e   : > { %v1457_v0 = vpack.c.bf16 %v1252_v57, %v1252_v57  ;;  %v2504_v1 = vpop.f32.mrb[7].mxu0  ;;  %v1458_v4 = vpack.c.bf16 %v1304_v60, %v1304_v60  ;;  %v2512_v5 = vpop.f32.mrb[7].mxu1  ;;  %v2694_v2 = vld [vmem:[%s3441_s6 + $0x8] sm:$0xff]  }
 0x26f   : > { %v2693_v1 = vld [vmem:[%s3441_s6] sm:$0xff]  }
 0x270   : > { %v1471_v6 = vsel %vm1466_vm3, %v1457_v0, 0  ;;  %v1517_v7 = vsel %vm1466_vm3, %v1458_v4, 0 }
 0x271   : > { %2530 = vmatpush3.bf16.xpose.msra.mxu0 %v1471_v6  ;;  %2536 = vmatpush3.bf16.xpose.msra.mxu1 %v1517_v7 }
 0x272   : > { %2541 = vmatprep.subr.bf16.mxu0 %v2811_v17  ;;  %2547 = vmatprep.subr.bf16.mxu1 %v2811_v17 }
 0x274   : > { %v1397_v19 = vpop.f32.mrb[8].mxu0  ;;  %v1449_v20 = vpop.f32.mrb[8].mxu1 }
 0x275   : > { %v1398_v22 = vadd.f32 %v1397_v19, %v1344_v16  ;;  %v2519_v23 = vpop.f32.mrb[9].mxu0  ;;  %v1450_v24 = vadd.f32 %v1449_v20, %v1348_v18  ;;  %v2527_v25 = vpop.f32.mrb[9].mxu1 }
 0x276   : > { %v1400_v26 = vpop.f32.mrb[10].mxu0  ;;  %v1452_v27 = vpop.f32.mrb[10].mxu1 }
 0x277   : > { %v1584_v28 = vpack.c.bf16 %v1398_v22, %v1398_v22  ;;  %v2520_v29 = vpop.f32.mrb[11].mxu0  ;;  %v1585_v30 = vpack.c.bf16 %v1450_v24, %v1450_v24  ;;  %v2528_v31 = vpop.f32.mrb[11].mxu1  ;;  %v2412_v22 = vld [vmem:[%s3442_s27] ss:$0 sm:$0xff] }
 0x278   : > { %2532 = vmatmul.mubr.msk.bf16.vlgmr.msra.gmra.mrb[12].mxu0 %vm1466_vm3, %v1455_v10  ;;  %2538 = vmatmul.mubr.msk.bf16.vlgmr.msra.gmra.mrb[12].mxu1 %vm1466_vm3, %v1456_v11 }
 0x279   : > { %2543 = vmatprep.mubr.msk.bf16.mxu0 %vm2812_vm1, %v2811_v17  ;;  %2549 = vmatprep.mubr.msk.bf16.mxu1 %vm2812_vm1, %v2811_v17  ;;  %v1591_v32 = vsel %vm1589_vm4, %v1584_v28, 0  ;;  %v1637_v33 = vsel %vm1589_vm4, %v1585_v30, 0 }
 0x27a   : > { %2542 = vmatpush3.bf16.msra.mxu0 %v1591_v32  ;;  %2548 = vmatpush3.bf16.msra.mxu1 %v1637_v33 }
 0x27b   : > { %2553 = vmatprep.subr.bf16.mxu0 %v2811_v17  ;;  %2559 = vmatprep.subr.bf16.mxu1 %v2811_v17 }
 0x34b   : > { %v1507_v35 = vpop.f32.mrb[12].mxu0  ;;  %v1553_v37 = vpop.f32.mrb[12].mxu1 }
 0x34c   : > { %v1508_v36 = vadd.f32 %v2403_v34, %v1507_v35  ;;  %v2533_v38 = vpop.f32.mrb[13].mxu0  ;;  %v2539_v39 = vpop.f32.mrb[13].mxu1  ;;  %v1554_v41 = vadd.f32 %v2403_v34, %v1553_v37  ;;  %v2695_v35 = vld [vmem:[%s3071_s20] sm:$0xff]  }
 0x34d   : > { %v1510_v40 = vpop.f32.mrb[14].mxu0  ;;  %v1556_v42 = vpop.f32.mrb[14].mxu1 }
 0x34e   : > { %v2534_v43 = vpop.f32.mrb[15].mxu0  ;;  %v1560_v44 = vsel %vm1559_vm5, %v1508_v36, -inf  ;;  %v2540_v45 = vpop.f32.mrb[15].mxu1  ;;  %v1563_v46 = vsel %vm1559_vm5, %v1554_v41, -inf  ;;  %v2413_v40 = vld [vmem:[%s3444_s5] ss:$0 sm:$0xff] }
 0x34f   : > { %1561 = vmax.xlane.f32.xlu0 %v1560_v44 }
 0x353   : > { %1564 = vmax.xlane.f32.xlu0 %v1563_v46  ;;  %v2697_v46 = vld [vmem:[%s3080_s24] sm:$0xff]  }
 0x3dc   : > { %v1562_v47 = vpop.xlane.xlu0 %1561 }
 0x3dd   : > { %v1566_v48 = vsub.f32 %v1508_v36, %v1562_v47  ;;  %v2696_v36 = vld [vmem:[%s3071_s20 + $0x8] sm:$0xff]   ;;  %s3445_s20 = sld [smem:[#allocation32_spill]] }
 0x3de   : > { %v2698_v47 = vld [vmem:[%s3080_s24 + $0x8] sm:$0xff]  }
 0x3df   : > { %v1568_v49 = vmul.f32 1.442695, %v1566_v48  ;;  %v2699_v48 = vld [vmem:[%s3080_s24 + $0x10] sm:$0xff]  }
 0x3e0   : > { %v1565_v50 = vpop.xlane.xlu0 %1564 }
 0x3e1   : > { %2701 = vpow2.f32 %v1568_v49  ;;  %v1567_v51 = vsub.f32 %v1554_v41, %v1565_v50  ;;  %v2700_v49 = vld [vmem:[%s3080_s24 + $0x18] sm:$0xff]   ;;  %v2415_v50 = vld [vmem:[%s958_s10] ss:$0 sm:$0xff] }
 0x3e3   : > { %v1570_v52 = vmul.f32 1.442695, %v1567_v51  ;;  %s3446_s19 = scalar_lea.vmem %s3445_s20, %s3009_s2  ;;  %s3452_s20 = sld [smem:[#allocation38_spill]] (!%p2427_p1) }
 0x3e4   : > { %v2414_v42 = vld [vmem:[%s3446_s19] ss:$0 sm:$0xff] }
 0x3e5   : > { %2703 = vpow2.f32 %v1570_v52 }
 0x3eb   : > { %v2702_v53 = vpop.eup %2701 }
 0x3ec   : > { %v1572_v54 = vsel %vm1559_vm5, %v2702_v53, 0.0 }
 0x3ed   : > { %1573 = vadd.xlane.f32.xlu1 %v1572_v54 }
 0x3ef   : > { %v2704_v55 = vpop.eup %2703 }
 0x3f0   : > { %v1575_v56 = vsel %vm1559_vm5, %v2704_v55, 0.0 }
 0x3f1   : > { %1576 = vadd.xlane.f32.xlu1 %v1575_v56 }
 0x47a   : > { %v1574_v57 = vpop.xlane.xlu1 %1573 }
 0x47b   : > { %2705 = vrcp.f32 %v1574_v57 }
 0x47e   : > { %v1577_v58 = vpop.xlane.xlu1 %1576 }
 0x47f   : > { %2707 = vrcp.f32 %v1577_v58 }
 0x485   : > { %v2706_v59 = vpop.eup %2705 }
 0x486   : > { %v1580_v60 = vmul.f32 %v2706_v59, %v2702_v53 }
 0x488   : > { %v1582_v61 = vpack.c.bf16 %v1580_v60, %v1580_v60 }
 0x489   : > { %v2708_v62 = vpop.eup %2707 }
 0x48a   : > { %v1581_v63 = vmul.f32 %v2708_v62, %v2704_v55  ;;  %2544 = vmatmul.mubr.msk.bf16.vlgmr.msra.gmra.mrb[16].mxu0 %vm1559_vm5, %v1582_v61 }
 0x48b   : > { %2555 = vmatprep.mubr.msk.bf16.mxu0 %vm2812_vm1, %v2811_v17  ;;  %2554 = vmatpush3.bf16.msra.mxu0 %v2693_v1  ;;  %v2419_v1 = vld [vmem:[%s966_s4] ss:$0 sm:$0xff] }
 0x48c   : > { %v1583_v0 = vpack.c.bf16 %v1581_v63, %v1581_v63  ;;  %2565 = vmatprep.subr.bf16.mxu0 %v2811_v17 }
 0x48e   : > { %2550 = vmatmul.mubr.msk.bf16.vlgmr.msra.gmra.mrb[16].mxu1 %vm1559_vm5, %v1583_v0 }
 0x48f   : > { %2561 = vmatprep.mubr.msk.bf16.mxu1 %vm2812_vm1, %v2811_v17  ;;  %2560 = vmatpush3.bf16.msra.mxu1 %v2694_v2 }
 0x490   : > { %2573 = vmatprep.subr.bf16.mxu1 %v2811_v17 }
 0x55d   : > { %v1627_v3 = vpop.f32.mrb[16].mxu0 }
 0x55e   : > { %v1679_v4 = vpack.c.bf16 %v1627_v3, %v1627_v3  ;;  %v2545_v5 = vpop.f32.mrb[17].mxu0 }
 0x55f   : > { %v1630_v6 = vpop.f32.mrb[18].mxu0 }
 0x560   : > { %v2546_v7 = vpop.f32.mrb[19].mxu0  ;;  %2556 = vmatmul.mubr.msk.bf16.vlgmr.msra.gmra.mrb[20].mxu0 %vm1466_vm3, %v1679_v4 }
 0x561   : > { %v1673_v8 = vpop.f32.mrb[16].mxu1  ;;  %2569 = vmatprep.mubr.msk.bf16.mxu0 %vm2812_vm1, %v2811_v17  ;;  %2566 = vmatpush3.bf16.msra.mxu0 %v2695_v35 }
 0x562   : > { %v1680_v9 = vpack.c.bf16 %v1673_v8, %v1673_v8  ;;  %v2551_v10 = vpop.f32.mrb[17].mxu1  ;;  %2567 = vmatprep.subr.bf16.mxu0 %v2811_v17 }
 0x563   : > { %v1676_v11 = vpop.f32.mrb[18].mxu1 }
 0x564   : > { %v2552_v12 = vpop.f32.mrb[19].mxu1  ;;  %2562 = vmatmul.mubr.msk.bf16.vlgmr.msra.gmra.mrb[20].mxu1 %vm1466_vm3, %v1680_v9 }
 0x565   : > { %2581 = vmatprep.mubr.msk.bf16.mxu1 %vm2812_vm1, %v2811_v17  ;;  %2568 = vmatpush3.bf16.msra.mxu0 %v2696_v36 }
 0x566   : > { %2574 = vmatpush3.bf16.msra.mxu1 %v2697_v46 }
 0x567   : > { %2575 = vmatprep.subr.bf16.mxu1 %v2811_v17 }
 0x56a   : > { %2576 = vmatpush3.bf16.msra.mxu1 %v2698_v47 }
 0x56b   : > { %2577 = vmatprep.subr.bf16.mxu1 %v2811_v17 }
 0x56e   : > { %2578 = vmatpush3.bf16.msra.mxu1 %v2699_v48 }
 0x56f   : > { %2579 = vmatprep.subr.bf16.mxu1 %v2811_v17 }
 0x572   : > { %2580 = vmatpush3.bf16.msra.mxu1 %v2700_v49 }
 0x633   : > { %v1728_v13 = vpop.f32.mrb[20].mxu0 }
 0x634   : > { %v2557_v14 = vpop.f32.mrb[21].mxu0  ;;  %v1783_v19 = vsel %vm1067_vm2, %v1728_v13, 0.0 }
 0x635   : > { %v1731_v15 = vpop.f32.mrb[22].mxu0 }
 0x636   : > { %v2558_v16 = vpop.f32.mrb[23].mxu0 }
 0x637   : > { %v1777_v18 = vpop.f32.mrb[20].mxu1 }
 0x638   : > { %v1784_v20 = vsel %vm1067_vm2, %v1777_v18, 0.0  ;;  %v2563_v23 = vpop.f32.mrb[21].mxu1 }
 0x639   : > { %v1785_v24 = vadd.f32 %v1784_v20, %v1783_v19  ;;  %v1780_v25 = vpop.f32.mrb[22].mxu1  ;;  %v2425_v19 = vld [vmem:[%s969_s13] ss:$0 sm:$0xff] }
 0x63a   : > { %v2564_v26 = vpop.f32.mrb[23].mxu1  ;;  %v2020_v25 = vld [vmem:[%s3451_s26] sm:$0xff] (!%p2427_p1) }
 0x63b   : > { %v1793_v27 = vadd.f32 %v2412_v22, %v1785_v24  ;;  %v2426_v22 = vld [vmem:[%s972_s14] ss:$0 sm:$0xff]  ;;  %v2021_v26 = vld [vmem:[%s3451_s26 + $0x8] sm:$0xff] (!%p2427_p1) }
 0x63d   : > { %v1794_v28 = vadd.f32 %v1793_v27, %v3120_v21  ;;  %v2022_v27 = vld [vmem:[%s3451_s26 + $0x10] sm:$0xff] (!%p2427_p1) }
 0x63f   : > { %v1797_v29 = vsel %vm1067_vm2, %v1794_v28, 0.0 }
 0x640   : > { %1798 = vadd.xlane.f32.xlu0 %v1797_v29  ;;  %v2597_v29 = vpack.c.bf16 (!%p2427_p1), %v2021_v26, %v2020_v25 }
 0x6cd   : > { %v1799_v30 = vpop.xlane.xlu0 %1798 }
 0x6ce   : > { %v1801_v31 = vmul.f32 0.03125, %v1799_v30  ;;  %v2023_v30 = vld [vmem:[%s3451_s26 + $0x18] sm:$0xff] (!%p2427_p1) }
 0x6d0   : > { %v1802_v32 = vsub.f32 %v1794_v28, %v1801_v31  ;;  %v2814_v28 = vmov (!%p2427_p1), 0.0|0.0   ;;  %v2816_v31 = vmov (!%p2427_p1), 0.0  }
 0x6d1   : > { %2596 = vmatprep.subr.bf16.mxu0 (!%p2427_p1), %v2814_v28 }
 0x6d2   : > { %v1803_v33 = vmul.f32 %v1802_v32, %v1802_v32 }
 0x6d4   : > { %v1804_v34 = vsel %vm1067_vm2, %v1803_v33, 0.0  ;;  %v2024_v33 = vld [vmem:[%s3452_s20] sm:$0x1] (!%p2427_p1) }
 0x6d5   : > { %1805 = vadd.xlane.f32.xlu1 %v1804_v34 }
 0x762   : > { %v1806_v21 = vpop.xlane.xlu1 %1805 }
 0x763   : > { %v1807_v37 = vmul.f32 0.03125, %v1806_v21 }
 0x765   : > { %v1808_v38 = vadd.f32 1e-12, %v1807_v37 }
 0x767   : > { %2709 = vrsqrt.f32 %v1808_v38 }
 0x771   : > { %v2710_v39 = vpop.eup %2709 }
 0x772   : > { %v1810_v41 = vmul.f32 %v2710_v39, %v1802_v32  ;;  %v2600_v32 = vpack.c.bf16 (!%p2427_p1), %v2023_v30, %v2022_v27 }
 0x774   : > { %v1817_v43 = vmul.f32 %v2413_v40, %v1810_v41 }
 0x776   : > { %v1824_v44 = vadd.f32 %v2414_v42, %v1817_v43 }
 0x778   : > { %v1825_v45 = vpack.c.bf16 %v1824_v44, %v1824_v44 }
 0x77a   : > { %2570 = vmatmul.mubr.msk.bf16.vlgmr.msra.gmra.mrb[24].mxu0 %vm1067_vm2, %v1825_v45 }
 0x77b   : > { %2593 = vmatprep.mubr.msk.f32.mxu0 (!%p2427_p1), %vm2815_vm7, %v2816_v31  ;;  %2598 = vmatpush3.bf16.msra.mxu0 (!%p2427_p1), %v2597_v29 }
 0x77c   : > { %2599 = vmatprep.subr.bf16.mxu0 (!%p2427_p1), %v2814_v28 }
 0x77f   : > { %2601 = vmatpush3.bf16.msra.mxu0 (!%p2427_p1), %v2600_v32 }
 0x84d   : > { %v1886_v51 = vpop.f32.mrb[24].mxu0 }
 0x84e   : > { %v1887_v52 = vadd.f32 %v2415_v50, %v1886_v51  ;;  %v2571_v53 = vpop.f32.mrb[25].mxu0 }
 0x84f   : > { %v1889_v54 = vpop.f32.mrb[26].mxu0 }
 0x850   : > { %v1892_v55 = vmul.f32 %v1887_v52, %v1887_v52  ;;  %v2572_v56 = vpop.f32.mrb[27].mxu0 }
 0x852   : > { %v1893_v57 = vmul.f32 %v1892_v55, %v1887_v52 }
 0x854   : > { %v1894_v58 = vmul.f32 0.044715, %v1893_v57 }
 0x856   : > { %v1895_v59 = vadd.f32 %v1894_v58, %v1887_v52 }
 0x858   : > { %v1896_v60 = vmul.f32 0.7978846, %v1895_v59 }
 0x85a   : > { %2711 = vtanh.f32 %v1896_v60 }
 0x864   : > { %v2712_v17 = vpop.eup %2711 }
 0x865   : > { %v1898_v61 = vadd.f32 1.0, %v2712_v17 }
 0x867   : > { %v1899_v62 = vmul.f32 0.5, %v1898_v61 }
 0x869   : > { %v1900_v63 = vmul.f32 %v1899_v62, %v1887_v52 }
 0x86b   : > { %v1901_v0 = vpack.c.bf16 %v1900_v63, %v1900_v63 }
 0x86d   : > { %2582 = vmatmul.mubr.msk.bf16.vlgmr.msra.gmra.mrb[24].mxu1 %vm1941_vm6, %v1901_v0 }
 0x940   : > { %v1979_v2 = vpop.f32.mrb[24].mxu1 }
 0x941   : > { %v1980_v3 = vadd.f32 %v2419_v1, %v1979_v2  ;;  %v2583_v4 = vpop.f32.mrb[25].mxu1 }
 0x942   : > { %v1982_v5 = vpop.f32.mrb[26].mxu1 }
 0x943   : > { %v2584_v6 = vpop.f32.mrb[27].mxu1  ;;  %v1985_v7 = vadd.f32 %v1980_v3, %v1824_v44 }
 0x945   : > { %v1988_v8 = vsel %vm1067_vm2, %v1985_v7, 0.0 }
 0x946   : > { %1989 = vadd.xlane.f32.xlu0 %v1988_v8 }
 0x9d3   : > { %v1990_v9 = vpop.xlane.xlu0 %1989 }
 0x9d4   : > { %v1991_v10 = vmul.f32 0.03125, %v1990_v9 }
 0x9d6   : > { %v1992_v11 = vsub.f32 %v1985_v7, %v1991_v10 }
 0x9d8   : > { %v1993_v12 = vmul.f32 %v1992_v11, %v1992_v11 }
 0x9da   : > { %v1994_v13 = vsel %vm1067_vm2, %v1993_v12, 0.0 }
 0x9db   : > { %1995 = vadd.xlane.f32.xlu1 %v1994_v13 }
 0xa68   : > { %v1996_v14 = vpop.xlane.xlu1 %1995 }
 0xa69   : > { %v1997_v15 = vmul.f32 0.03125, %v1996_v14 }
 0xa6b   : > { %v1998_v16 = vadd.f32 1e-12, %v1997_v15 }
 0xa6d   : > { %2713 = vrsqrt.f32 %v1998_v16 }
 0xa77   : > { %v2714_v18 = vpop.eup %2713 }
 0xa78   : > { %v2000_v20 = vmul.f32 %v2714_v18, %v1992_v11  ;;  %2019 = sbr.rel (%p2427_p1) target bundleno = 2901 (0xb55), region = 116 }
 0xa7a   : > { %v2007_v23 = vmul.f32 %v2425_v19, %v2000_v20 }
 0xa7c   : > { %v2014_v24 = vadd.f32 %v2426_v22, %v2007_v23 }
 0xa7e   : > { %2015 = vst.msk [vmem:[#allocation2] sm:$0xff] %vm1067_vm2, %v2014_v24  ;;  %2594 = vmatmul.mubr.msk.f32.vlgmr.msra.gmra.mrb[0].mxu0 (!%p2427_p1), %vm1067_vm2, %v2014_v24 }
 0xb51   : > { %v2094_v34 = vpop.f32.mrb[0].mxu0 }
 0xb52   : > { %v2095_v35 = vadd.f32 %v2094_v34, %v2024_v33  ;;  %v2595_v36 = vpop.f32.mrb[1].mxu0 }
 0xb54   : > { %2098 = vst [vmem:[%s3096_s17] sm:$0x1] %v2095_v35 }
 0xb55 PF: > { %s3453_s19 = sld [smem:[#allocation9_spill]]  ;;  %s3455_s12 = sld [smem:[#allocation39_spill]] }
 0xb56   : > { %s2112_s30 = sshll.u32 %s3096_s17, 4  ;;  %s3456_s22 = sand.u32 1, %s2785_s28   ;;  %s2113_s30 = int_to_ptr.vmem [resolvable:$true] %s2112_s30 }
 0xb57   : > { %s2100_s1 = scalar_lea.sflag [#allocation4], %s3456_s22  ;;  %s2715_s23 = scalar_lea.vmem %s2113_s30, 16 }
 0xb58   : > { %p2716_p2 = scmp.ne.s32.totalorder %s2113_s30, %s2715_s23  ;;  %s2817_s6 = smov [#allocation3]  }
 0xb59   : > { %s2719_s3 = sshll.u32 %s2817_s6, 4  ;;  %s2720_s3 = int_to_ptr.vmem [resolvable:$false] %s2719_s3 }
 0xb5a   : > { %p2717_p4 = pnand %p2716_p2, %p2982_p3  ;;  %s2721_s0 = scalar_lea.vmem %s2720_s3, 32 }
 0xb5b   : > { %s2429_s7 = sshll.u32 %s3453_s19, 4  ;;  %p2722_p6 = scmp.lt.s32.totalorder %s2113_s30, %s2720_s3 }
 0xb5c   : > { %s3288_s4 = scalar_lea.hbm %s3455_s12, %s2429_s7  ;;  %p2718_p5 = pneg %p2717_p4 }
 0xb5d   : > { %p2723_p7 = scmp.lt.s32.totalorder %s2721_s0, %s2715_s23 }
 0xb5f   : > { %p2724_p8 = por %p2723_p7, %p2722_p6 }
 0xb61   : > { %p2725_p10 = pnand %p2724_p8, %p2718_p5 }
 0xb63   : > { %2728 = shalt.err (!%p2725_p10)
}
 0xb64   : > { %s2729_s17 = scalar_lea.hbm %s3288_s4, 16  ;;  %s2733_s8 = scalar_lea.hbm %s3455_s12, 32 }
 0xb65   : > { %p2730_p11 = scmp.ne.s32.totalorder %s3288_s4, %s2729_s17  ;;  %p2734_p0 = scmp.lt.u32.totalorder %s3288_s4, %s3455_s12 }
 0xb66   : > { %p2735_p1 = scmp.lt.u32.totalorder %s2733_s8, %s2729_s17  ;;  %p2737_p4 = scmp.lt.u32.totalorder %s2729_s17, %s3288_s4 }
 0xb67   : > { %p2731_p12 = pnand %p2730_p11, %p2982_p3 }
 0xb68   : > { %p2736_p2 = por %p2735_p1, %p2734_p0 }
 0xb69   : > { %p2732_p13 = pneg %p2731_p12 }
 0xb6a   : > { %p2738_p5 = por %p2737_p4, %p2736_p2 }
 0xb6c   : > { %p2739_p6 = pnand %p2738_p5, %p2732_p13 }
 0xb6e   : > { %2742 = shalt.err (!%p2739_p6)
}
 0xb6f   : > { %2602 = dma.vmem_to_hbm [thread:$0]  (%p2982_p3), %s2113_s30, 16, %s3288_s4, %s2100_s1  }
 0xb70 PF: > { %s3457_s14 = sld [smem:[#allocation12_spill]]  ;;  %s3458_s2 = sld [smem:[#allocation6_spill]] }
 0xb76   : > { %p2608_p7 = scmp.ge.s32.totalorder %s3457_s14, 2  ;;  %s2124_s25 = sand.u32 1, %s3458_s2  }
 0xb77   : > { %s2125_s20 = scalar_lea.sflag [#allocation4], %s2124_s25 }
 0xb78   : > { %p2605_p8 = pnand %p2608_p7, %p2992_p9 }
 0xb7a   : > { %2776 = dma.done.wait (!%p2605_p8), %s2125_s20, 16  }
 0xb7b   : > { %2778 = vsyncadd (!%p2605_p8), %s2125_s20, 4294967280  ;;  %s35_s1 = sadd.s32 1, %s3457_s14   ;;  %s3460_s19 = sld [smem:[#allocation7_spill]] }
 0xb7c   : > { %p32_p10 = scmp.ge.s32.totalorder %s35_s1, 6   ;;  %s3461_s29 = sld [smem:[#allocation17_spill]] }
 0xb7d   : > { %s3462_s30 = sld [smem:[#allocation10_spill]]  ;;  %s3463_s4 = sld [smem:[#allocation11_spill]] }
 0xb7e   : > { %s3464_s0 = sld [smem:[#allocation13_spill]]  ;;  %s3465_s23 = sld [smem:[#allocation15_spill]] }
 0xb7f   : > { %s3466_s3 = smov %s2785_s28  ;;  %34 = sbr.rel (!%p32_p10) target bundleno = 25 (0x19), region = 202 }
 0xb81   : > { %s3467_s28 = smov %s3460_s19 }
 0xb86   :  { %2129 = vsyncpa [#allocation4], 1 }
 0xb87   :  { %2131 = vsyncpa [#allocation4 + $0x1], 1 }

</bundles_post_ra>
